<compile_context>
chip_gen: v5e
topology: v5e:2x2
jax: 0.10.0
libtpu: 0.0.40
codegen_flags: <defaults>
</compile_context>

<pallas_src>
import functools

import jax
import jax.numpy as jnp
from jax.experimental import pallas as pl
from jax.experimental.pallas import tpu as pltpu

_VMEM_LIMIT = 64 * 1024 * 1024  # explicit scoped-VMEM budget (fits v5e/v6e/v7x)


def _round_up(n, m=128):
    return ((n + m - 1) // m) * m


def _pick_rows(nrows, ncols, max_m=1024):
    """Largest divisor TR of nrows with TR*ncols <= max_m (fallback 1).

    Bounds the per-step (TR*ncols, Npad) f32 accumulator and gives the pipeline
    several grid steps per image to overlap DMA with MXU work."""
    best = 1
    for tr in range(1, nrows + 1):
        if nrows % tr == 0 and tr * ncols <= max_m:
            best = tr
    return best


# ---------------------------------------------------------------------------
# down = LeakyReLU(0.2) -> Conv2d(Cin, OCd, 4, 2, 1, bias=False)  (+ BN stats)
# ---------------------------------------------------------------------------
def _down_conv_kernel(x_ref, w_ref, o_ref, stat_ref, *, tr, ow, cin, oc, slope):
    """One (batch, output-row-tile) step.

    x_ref holds the full zero-padded, column-pair-packed image of this batch
    (constant block along the row-tile axis -> fetched once per batch); only
    the 2*tr+2 rows needed by this tile are loaded.  Row parity is split
    in-kernel (free leading-dim reshape); each of the 8 (kh, packed-kw) taps is
    a contiguous slice matmul'd with a (2*Cin, Npad) bf16 weight, accumulated
    in f32.  The epilogue emits per-tile BN partial sums and stores the real
    (unpadded) output channels in bf16."""
    rt = pl.program_id(1)
    r0 = pl.multiple_of(rt * (2 * tr), 2 * tr)
    v = x_ref[0, pl.ds(r0, 2 * tr + 2), :, :]            # (2tr+2, ow+1, 2cin) f32
    v = jnp.where(v >= 0, v, slope * v)                   # activation once, in f32
    v = v.astype(jnp.bfloat16)
    v = v.reshape(tr + 1, 2, ow + 1, 2 * cin)             # row-parity split (free)

    npad = w_ref.shape[-1]
    m = tr * ow
    acc = jnp.zeros((m, npad), jnp.float32)
    for kh in range(4):
        rows = v[:, kh % 2]                                # (tr+1, ow+1, 2cin)
        a = kh // 2
        for kwp in range(2):
            tap = rows[a:a + tr, kwp:kwp + ow, :].reshape(m, 2 * cin)
            acc = acc + jnp.dot(tap, w_ref[kh * 2 + kwp],
                                preferred_element_type=jnp.float32)

    s = jnp.sum(acc, axis=0, keepdims=True)                # BN partial sums (f32)
    q = jnp.sum(acc * acc, axis=0, keepdims=True)
    stat_ref[0, 0] = jnp.concatenate([s, q], axis=0)
    o_ref[0] = acc.reshape(tr, ow, npad)[:, :, :oc].astype(jnp.bfloat16)


def conv_down_bn_stats(x_nhwc, w_pt):
    """Fused LeakyReLU(0.2)+Conv2d(4,2,1)+BN-partial-stats.
    x_nhwc: (B, H, W, Cin) f32.  w_pt: PyTorch (OCd, Cin, 4, 4).
    Returns (enc (B, H/2, W/2, OCd) bf16, stats (B, nRT, 2, npad) f32)."""
    B, H, W, C = x_nhwc.shape
    assert H % 2 == 0 and W % 2 == 0
    OCd = w_pt.shape[0]
    OH, OW = H // 2, W // 2
    npad = _round_up(OCd, 128)

    # zero-pad (one XLA pass) + FREE contiguous reshape packing column pairs
    xp = jnp.pad(x_nhwc.astype(jnp.float32), ((0, 0), (1, 1), (1, 1), (0, 0)))
    xpk = xp.reshape(B, H + 2, OW + 1, 2 * C)

    # 8 tap matrices (kh, packed-kw), each (2*Cin, npad); lane pad only here
    taps = []
    for kh in range(4):
        for kwp in range(2):
            w0 = jnp.transpose(w_pt[:, :, kh, 2 * kwp])        # col 2j   -> chans [0:C]
            w1 = jnp.transpose(w_pt[:, :, kh, 2 * kwp + 1])    # col 2j+1 -> chans [C:2C]
            t = jnp.concatenate([w0, w1], axis=0)              # (2C, OCd)
            taps.append(jnp.pad(t, ((0, 0), (0, npad - OCd))))
    wk = jnp.stack(taps, axis=0).astype(jnp.bfloat16)          # (8, 2C, npad)

    TR = _pick_rows(OH, OW)
    nRT = OH // TR
    kern = functools.partial(_down_conv_kernel, tr=TR, ow=OW, cin=C, oc=OCd, slope=0.2)
    enc, stats = pl.pallas_call(
        kern,
        out_shape=(jax.ShapeDtypeStruct((B, OH, OW, OCd), jnp.bfloat16),
                   jax.ShapeDtypeStruct((B, nRT, 2, npad), jnp.float32)),
        grid=(B, nRT),
        in_specs=[pl.BlockSpec((1, H + 2, OW + 1, 2 * C), lambda b, r: (b, 0, 0, 0)),
                  pl.BlockSpec((8, 2 * C, npad), lambda b, r: (0, 0, 0))],
        out_specs=(pl.BlockSpec((1, TR, OW, OCd), lambda b, r: (b, r, 0, 0)),
                   pl.BlockSpec((1, 1, 2, npad), lambda b, r: (b, r, 0, 0))),
        compiler_params=pltpu.CompilerParams(
            dimension_semantics=("parallel", "parallel"),
            vmem_limit_bytes=_VMEM_LIMIT),
    )(xpk, wk)
    return enc, stats


# ---------------------------------------------------------------------------
# up = ReLU -> ConvTranspose2d(Cs, OC, 4, 2, 1, bias=False)       (+ BN stats)
# ---------------------------------------------------------------------------
def _up_conv_kernel(x_ref, w_ref, o_ref, stat_ref, *, tru, ws, cs, oc):
    """Sub-pixel (phase) transposed conv.  Each matmul's weight matrix emits
    BOTH column phases (packed channels [0:OC] = even cols, [OC:2OC] = odd
    cols), so the column interleave becomes a free reshape downstream; the two
    row phases are interleaved in-kernel (cheap leading-dim stack)."""
    rt = pl.program_id(1)
    r0 = pl.multiple_of(rt * tru, tru)
    v = x_ref[0, pl.ds(r0, tru + 2), :, :]                 # (tru+2, ws+2, cs) bf16
    v = jnp.maximum(v.astype(jnp.float32), 0.0).astype(jnp.bfloat16)

    np2 = w_ref.shape[-1]
    m = tru * ws
    s_tot = jnp.zeros((1, np2), jnp.float32)
    q_tot = jnp.zeros((1, np2), jnp.float32)
    rows = []
    for a in range(2):                                     # output-row phase
        acc = jnp.zeros((m, np2), jnp.float32)
        for dy in range(2):
            for cofs in range(3):                          # column offset 0..2
                tap = v[a + dy:a + dy + tru, cofs:cofs + ws, :].reshape(m, cs)
                acc = acc + jnp.dot(tap, w_ref[a * 6 + dy * 3 + cofs],
                                    preferred_element_type=jnp.float32)
        s_tot = s_tot + jnp.sum(acc, axis=0, keepdims=True)
        q_tot = q_tot + jnp.sum(acc * acc, axis=0, keepdims=True)
        rows.append(acc.reshape(tru, ws, np2)[:, :, :2 * oc])
    stat_ref[0, 0] = jnp.concatenate([s_tot, q_tot], axis=0)
    inter = jnp.stack(rows, axis=1)                        # (tru, 2, ws, 2oc)
    o_ref[0] = inter.reshape(2 * tru, ws, 2 * oc).astype(jnp.bfloat16)


def conv_up_bn_stats(sub_nhwc, w_pt):
    """Fused ReLU+ConvTranspose2d(4,2,1)+BN-partial-stats.
    sub_nhwc: (B, Hs, Ws, Cs) bf16.  w_pt: PyTorch (Cs, OC, 4, 4).
    Returns (dec_packed (B, 2Hs, Ws, 2*OC) bf16, stats (B, nRT, 2, np2) f32).
    A free contiguous reshape of dec_packed gives NHWC (B, 2Hs, 2Ws, OC)."""
    B, Hs, Ws, Cs = sub_nhwc.shape
    OC = w_pt.shape[1]
    np2 = _round_up(2 * OC, 128)

    xp = jnp.pad(sub_nhwc.astype(jnp.bfloat16), ((0, 0), (1, 1), (1, 1), (0, 0)))

    # 12 tap matrices, index t = a*6 + dy*3 + cofs; each (Cs, np2) emitting both
    # column phases:  cols [0:OC] <- phase b=0 (dx=cofs), [OC:2OC] <- b=1 (dx=cofs-1)
    w_f32 = w_pt.astype(jnp.float32)
    taps = []
    for a in range(2):
        for dy in range(2):
            for cofs in range(3):
                t = jnp.zeros((Cs, np2), jnp.float32)
                if cofs <= 1:
                    t = t.at[:, 0:OC].set(w_f32[:, :, 3 - a - 2 * dy, 3 - 2 * cofs])
                if cofs >= 1:
                    t = t.at[:, OC:2 * OC].set(w_f32[:, :, 3 - a - 2 * dy, 4 - 2 * cofs])
                taps.append(t)
    wk = jnp.stack(taps, axis=0).astype(jnp.bfloat16)          # (12, Cs, np2)

    TRu = _pick_rows(Hs, Ws)
    nRT = Hs // TRu
    kern = functools.partial(_up_conv_kernel, tru=TRu, ws=Ws, cs=Cs, oc=OC)
    dec, stats = pl.pallas_call(
        kern,
        out_shape=(jax.ShapeDtypeStruct((B, 2 * Hs, Ws, 2 * OC), jnp.bfloat16),
                   jax.ShapeDtypeStruct((B, nRT, 2, np2), jnp.float32)),
        grid=(B, nRT),
        in_specs=[pl.BlockSpec((1, Hs + 2, Ws + 2, Cs), lambda b, r: (b, 0, 0, 0)),
                  pl.BlockSpec((12, Cs, np2), lambda b, r: (0, 0, 0))],
        out_specs=(pl.BlockSpec((1, 2 * TRu, Ws, 2 * OC), lambda b, r: (b, r, 0, 0)),
                   pl.BlockSpec((1, 1, 2, np2), lambda b, r: (b, r, 0, 0))),
        compiler_params=pltpu.CompilerParams(
            dimension_semantics=("parallel", "parallel"),
            vmem_limit_bytes=_VMEM_LIMIT),
    )(xp, wk)
    return dec, stats


# ---------------------------------------------------------------------------
# BatchNorm2d: finalize (tiny, jnp) + lane-dense tiled apply pass
# ---------------------------------------------------------------------------
def _bn_scale_shift(s, q, count, gamma, beta, eps=1e-5):
    mean = s / count
    var = jnp.maximum(q / count - mean * mean, 0.0)
    inv = jax.lax.rsqrt(var + eps)
    scale = gamma.astype(jnp.float32) * inv
    shift = beta.astype(jnp.float32) - mean * scale
    return scale, shift


def _bn_apply_kernel(x_ref, sc_ref, sh_ref, o_ref):
    x = x_ref[...].astype(jnp.float32)
    o_ref[...] = (x * sc_ref[...] + sh_ref[...]).astype(o_ref.dtype)


def bn_apply(x, scale, shift):
    """x: (..., C) bf16; scale/shift: (C,) f32.  Lane-dense tiled x*scale+shift.
    TODO(synk): running-stats update / eval-mode BN not modeled."""
    shape = x.shape
    c = shape[-1]
    total = x.size
    if c % 128 == 0:
        lane = c
    elif 128 % c == 0 and total % 128 == 0:
        lane = 128                                           # lane-dense re-view
    else:
        lane = c                                             # masked-store fallback
    reps = lane // c
    x2 = x.reshape(-1, lane)                                 # free contiguous reshape
    m = x2.shape[0]
    sc = jnp.tile(scale, reps).reshape(1, lane).astype(jnp.float32)
    sh = jnp.tile(shift, reps).reshape(1, lane).astype(jnp.float32)
    tm = min(1024, m)
    if m > 8:
        tm = max(8, (tm // 8) * 8)
    out = pl.pallas_call(
        _bn_apply_kernel,
        out_shape=jax.ShapeDtypeStruct((m, lane), x.dtype),
        grid=(pl.cdiv(m, tm),),
        in_specs=[pl.BlockSpec((tm, lane), lambda i: (i, 0)),
                  pl.BlockSpec((1, lane), lambda i: (0, 0)),
                  pl.BlockSpec((1, lane), lambda i: (0, 0))],
        out_specs=pl.BlockSpec((tm, lane), lambda i: (i, 0)),
        compiler_params=pltpu.CompilerParams(
            dimension_semantics=("parallel",),
            vmem_limit_bytes=_VMEM_LIMIT),
    )(x2, sc, sh)
    return out.reshape(shape)


# ---------------------------------------------------------------------------
# UnetSkipConnectionBlock forward (intermediate block, norm_layer=BatchNorm2d)
#   down = [LeakyReLU(0.2), Conv2d(input_nc, inner_nc, 4, 2, 1, bias=False), BN]
#   up   = [ReLU, ConvTranspose2d(inner_nc*2, outer_nc, 4, 2, 1, bias=False), BN]
#   forward: enc = down(x); sub, encode = submodule(enc, style, skel);
#            dec = up(sub); return cat([x, dec], 1), encode
# ---------------------------------------------------------------------------
def unet_block_forward(params, x_nchw, style=None, skel=None, submodule=None, eps=1e-5):
    inner_nc = params["down_w"].shape[0]
    outer_nc = params["up_w"].shape[1]

    x_nhwc = jnp.transpose(x_nchw, (0, 2, 3, 1)).astype(jnp.float32)   # module boundary
    B, H, W, _ = x_nhwc.shape

    # ---- down path: conv (+ fused BN stats) -> finalize -> BN apply ----
    enc_pre, d_stats = conv_down_bn_stats(x_nhwc, params["down_w"])
    tot = jnp.sum(d_stats, axis=(0, 1))                                 # (2, npad)
    d_scale, d_shift = _bn_scale_shift(tot[0, :inner_nc], tot[1, :inner_nc],
                                       float(B * (H // 2) * (W // 2)),
                                       params["down_gamma"], params["down_beta"], eps)
    enc = bn_apply(enc_pre, d_scale, d_shift)           # (B, H/2, W/2, inner_nc) bf16

    if style is None:
        return submodule(enc)

    # ---- submodule (NHWC end-to-end) ----
    sub, encode = submodule(enc, style, skel)           # (B, H/2, W/2, 2*inner_nc)

    # ---- up path: conv (+ fused BN stats, phase-packed) -> finalize -> BN apply ----
    dec_pk, u_stats = conv_up_bn_stats(sub, params["up_w"])
    tot_u = jnp.sum(u_stats, axis=(0, 1))                               # (2, np2)
    s_u = tot_u[0, :outer_nc] + tot_u[0, outer_nc:2 * outer_nc]
    q_u = tot_u[1, :outer_nc] + tot_u[1, outer_nc:2 * outer_nc]
    u_scale, u_shift = _bn_scale_shift(s_u, q_u, float(B * H * W),
                                       params["up_gamma"], params["up_beta"], eps)
    dec_pk = bn_apply(dec_pk, jnp.concatenate([u_scale, u_scale]),
                      jnp.concatenate([u_shift, u_shift]))
    dec = dec_pk.reshape(B, H, W, outer_nc)             # FREE reshape -> NHWC

    # ---- skip connection at the module (NCHW) boundary ----
    dec_nchw = jnp.transpose(dec.astype(x_nchw.dtype), (0, 3, 1, 2))
    return jnp.concatenate([x_nchw, dec_nchw], axis=1), encode


def synthetic_submodule(enc_nhwc, style=None, skel=None):
    # TODO(synk): stands in for the recursive inner UnetSkipConnectionBlock (a
    # constructor arg, not this module's compute); returns channel-duplicated
    # features (2*inner_nc channels, NHWC) and `style` as encode.
    dup = jnp.concatenate([enc_nhwc, enc_nhwc], axis=-1)
    if style is None:
        return dup
    return dup, style


# ---------------------------------------------------------------------------
# Pure-JAX reference (f32, NCHW, lax convs) for numerical validation
# ---------------------------------------------------------------------------
def _reference_forward(params, x_nchw, style, skel):
    def bn(y, g, b):
        mean = jnp.mean(y, axis=(0, 2, 3), keepdims=True)
        var = jnp.mean((y - mean) ** 2, axis=(0, 2, 3), keepdims=True)
        yhat = (y - mean) * jax.lax.rsqrt(var + 1e-5)
        return yhat * g.reshape(1, -1, 1, 1) + b.reshape(1, -1, 1, 1)

    a = jnp.where(x_nchw >= 0, x_nchw, 0.2 * x_nchw)
    enc = jax.lax.conv_general_dilated(
        a, params["down_w"], window_strides=(2, 2), padding=((1, 1), (1, 1)),
        dimension_numbers=("NCHW", "OIHW", "NCHW"))
    enc = bn(enc, params["down_gamma"], params["down_beta"])
    sub = jnp.concatenate([enc, enc], axis=1)
    encode = style
    r = jnp.maximum(sub, 0.0)
    w_up = jnp.transpose(params["up_w"], (1, 0, 2, 3))[:, :, ::-1, ::-1]
    dec = jax.lax.conv_general_dilated(
        r, w_up, window_strides=(1, 1), padding=((2, 2), (2, 2)),
        lhs_dilation=(2, 2), dimension_numbers=("NCHW", "OIHW", "NCHW"))
    dec = bn(dec, params["up_gamma"], params["up_beta"])
    return jnp.concatenate([x_nchw, dec], axis=1), encode


# ---------------------------------------------------------------------------
if __name__ == "__main__":
    key = jax.random.PRNGKey(0)
    B, outer_nc, inner_nc, H, W, emb = 2, 4, 8, 16, 16, 128
    input_nc = outer_nc  # default: input_nc = outer_nc

    k1, k2, k3, k4, k5, k6, k7, k8 = jax.random.split(key, 8)
    params = {
        # Conv2d(input_nc, inner_nc, 4, 2, 1, bias=False): (out, in, kh, kw)
        "down_w": 0.1 * jax.random.normal(k1, (inner_nc, input_nc, 4, 4), jnp.float32),
        "down_gamma": jnp.ones((inner_nc,), jnp.float32)
        + 0.1 * jax.random.normal(k2, (inner_nc,), jnp.float32),
        "down_beta": 0.1 * jax.random.normal(k3, (inner_nc,), jnp.float32),
        # ConvTranspose2d(inner_nc*2, outer_nc, 4, 2, 1, bias=False): (in, out, kh, kw)
        "up_w": 0.1 * jax.random.normal(k4, (inner_nc * 2, outer_nc, 4, 4), jnp.float32),
        "up_gamma": jnp.ones((outer_nc,), jnp.float32)
        + 0.1 * jax.random.normal(k5, (outer_nc,), jnp.float32),
        "up_beta": 0.1 * jax.random.normal(k6, (outer_nc,), jnp.float32),
    }

    x = jax.random.normal(k7, (B, input_nc, H, W), jnp.float32)
    style = jax.random.normal(k8, (B, emb), jnp.float32)

    fwd = jax.jit(functools.partial(unet_block_forward, submodule=synthetic_submodule))
    out, encode = fwd(params, x, style, None)
    out = jax.block_until_ready(out)
    encode = jax.block_until_ready(encode)

    assert out.shape == (B, input_nc + outer_nc, H, W), out.shape
    assert encode.shape == (B, emb), encode.shape
    assert bool(jnp.all(jnp.isfinite(out)))

    # numerical check vs. a pure-JAX f32 reference
    # (bf16 MXU operands + bf16 HBM intermediates => loose element-wise tol)
    ref_out, _ = _reference_forward(params, x, style, None)
    err_max = float(jnp.max(jnp.abs(out - ref_out)))
    err_mean = float(jnp.mean(jnp.abs(out - ref_out)))
    assert err_max < 1.5e-1, f"max abs error vs reference: {err_max}"
    assert err_mean < 1.5e-2, f"mean abs error vs reference: {err_mean}"

    print("KERNEL_OK")
</pallas_src>

<mosaic_0001>
module attributes {stable_mosaic.version = 11 : i64} {
  func.func @_down_conv_kernel(%arg0: i32, %arg1: i32, %arg2: memref<1x18x9x8xf32, #tpu.memory_space<vmem>>, %arg3: memref<8x8x128xbf16, #tpu.memory_space<vmem>>, %arg4: memref<1x8x8x8xbf16, #tpu.memory_space<vmem>>, %arg5: memref<1x1x2x128xf32, #tpu.memory_space<vmem>>) attributes {dimension_semantics = [#tpu.dimension_semantics<parallel>, #tpu.dimension_semantics<parallel>], iteration_bounds = array<i64: 2, 1>, scalar_prefetch = 0 : i64, scratch_operands = 0 : i64, tpu.core_type = #tpu.core_type<tc>, window_params = [{transform_indices = @transform_0, window_bounds = array<i64: 1, 18, 9, 8>}, {pipeline_mode = #tpu.pipeline_mode<synchronous>, transform_indices = @transform_1, window_bounds = array<i64: 8, 8, 128>}, {transform_indices = @transform_2, window_bounds = array<i64: 1, 8, 8, 8>}, {transform_indices = @transform_3, window_bounds = array<i64: 1, 1, 2, 128>}]} {
    %c16_i32 = arith.constant 16 : i32
    %0 = arith.muli %arg1, %c16_i32 : i32
    %1 = tpu.assume_multiple %0, 16 : i32
    %c0 = arith.constant 0 : index
    %2 = arith.index_cast %1 : i32 to index
    %c0_0 = arith.constant 0 : index
    %c0_1 = arith.constant 0 : index
    %3 = vector.load %arg2[%c0, %2, %c0_0, %c0_1] : memref<1x18x9x8xf32, #tpu.memory_space<vmem>>, vector<1x18x9x8xf32>
    %4 = vector.shape_cast %3 : vector<1x18x9x8xf32> to vector<18x9x8xf32>
    %cst = arith.constant 0.000000e+00 : f32
    %5 = vector.broadcast %cst : f32 to vector<18x9x8xf32>
    %6 = arith.cmpf oge, %4, %5 : vector<18x9x8xf32>
    %cst_2 = arith.constant 2.000000e-01 : f32
    %7 = vector.broadcast %cst_2 : f32 to vector<18x9x8xf32>
    %8 = arith.mulf %7, %4 : vector<18x9x8xf32>
    %9 = arith.select %6, %4, %8 : vector<18x9x8xi1>, vector<18x9x8xf32>
    %10 = arith.truncf %9 : vector<18x9x8xf32> to vector<18x9x8xbf16>
    %11 = vector.shape_cast %10 : vector<18x9x8xbf16> to vector<9x2x9x8xbf16>
    %cst_3 = arith.constant 0.000000e+00 : f32
    %12 = vector.broadcast %cst_3 : f32 to vector<64x128xf32>
    %13 = vector.extract_strided_slice %11 {offsets = [0, 0, 0, 0], sizes = [9, 1, 9, 8], strides = [1, 1, 1, 1]} : vector<9x2x9x8xbf16> to vector<9x1x9x8xbf16>
    %14 = vector.shape_cast %13 : vector<9x1x9x8xbf16> to vector<9x9x8xbf16>
    %15 = vector.extract_strided_slice %14 {offsets = [0, 0, 0], sizes = [8, 8, 8], strides = [1, 1, 1]} : vector<9x9x8xbf16> to vector<8x8x8xbf16>
    %16 = vector.shape_cast %15 : vector<8x8x8xbf16> to vector<64x8xbf16>
    %c0_4 = arith.constant 0 : index
    %c0_5 = arith.constant 0 : index
    %c0_6 = arith.constant 0 : index
    %17 = vector.load %arg3[%c0_4, %c0_5, %c0_6] : memref<8x8x128xbf16, #tpu.memory_space<vmem>>, vector<1x8x128xbf16>
    %18 = vector.shape_cast %17 : vector<1x8x128xbf16> to vector<8x128xbf16>
    %cst_7 = arith.constant dense<0.000000e+00> : vector<64x128xf32>
    %19 = tpu.matmul %16, %18, %cst_7 {dimension_numbers = #tpu.dot_dimension_numbers<[1], [0], [0], [1], [0, 0, 1, 1], [], []>} : vector<64x8xbf16>, vector<8x128xbf16>, vector<64x128xf32> -> vector<64x128xf32>
    %20 = arith.addf %12, %19 : vector<64x128xf32>
    %21 = vector.extract_strided_slice %14 {offsets = [0, 1, 0], sizes = [8, 8, 8], strides = [1, 1, 1]} : vector<9x9x8xbf16> to vector<8x8x8xbf16>
    %22 = vector.shape_cast %21 : vector<8x8x8xbf16> to vector<64x8xbf16>
    %c1 = arith.constant 1 : index
    %c0_8 = arith.constant 0 : index
    %c0_9 = arith.constant 0 : index
    %23 = vector.load %arg3[%c1, %c0_8, %c0_9] : memref<8x8x128xbf16, #tpu.memory_space<vmem>>, vector<1x8x128xbf16>
    %24 = vector.shape_cast %23 : vector<1x8x128xbf16> to vector<8x128xbf16>
    %cst_10 = arith.constant dense<0.000000e+00> : vector<64x128xf32>
    %25 = tpu.matmul %22, %24, %cst_10 {dimension_numbers = #tpu.dot_dimension_numbers<[1], [0], [0], [1], [0, 0, 1, 1], [], []>} : vector<64x8xbf16>, vector<8x128xbf16>, vector<64x128xf32> -> vector<64x128xf32>
    %26 = arith.addf %20, %25 : vector<64x128xf32>
    %27 = vector.extract_strided_slice %11 {offsets = [0, 1, 0, 0], sizes = [9, 1, 9, 8], strides = [1, 1, 1, 1]} : vector<9x2x9x8xbf16> to vector<9x1x9x8xbf16>
    %28 = vector.shape_cast %27 : vector<9x1x9x8xbf16> to vector<9x9x8xbf16>
    %29 = vector.extract_strided_slice %28 {offsets = [0, 0, 0], sizes = [8, 8, 8], strides = [1, 1, 1]} : vector<9x9x8xbf16> to vector<8x8x8xbf16>
    %30 = vector.shape_cast %29 : vector<8x8x8xbf16> to vector<64x8xbf16>
    %c2 = arith.constant 2 : index
    %c0_11 = arith.constant 0 : index
    %c0_12 = arith.constant 0 : index
    %31 = vector.load %arg3[%c2, %c0_11, %c0_12] : memref<8x8x128xbf16, #tpu.memory_space<vmem>>, vector<1x8x128xbf16>
    %32 = vector.shape_cast %31 : vector<1x8x128xbf16> to vector<8x128xbf16>
    %cst_13 = arith.constant dense<0.000000e+00> : vector<64x128xf32>
    %33 = tpu.matmul %30, %32, %cst_13 {dimension_numbers = #tpu.dot_dimension_numbers<[1], [0], [0], [1], [0, 0, 1, 1], [], []>} : vector<64x8xbf16>, vector<8x128xbf16>, vector<64x128xf32> -> vector<64x128xf32>
    %34 = arith.addf %26, %33 : vector<64x128xf32>
    %35 = vector.extract_strided_slice %28 {offsets = [0, 1, 0], sizes = [8, 8, 8], strides = [1, 1, 1]} : vector<9x9x8xbf16> to vector<8x8x8xbf16>
    %36 = vector.shape_cast %35 : vector<8x8x8xbf16> to vector<64x8xbf16>
    %c3 = arith.constant 3 : index
    %c0_14 = arith.constant 0 : index
    %c0_15 = arith.constant 0 : index
    %37 = vector.load %arg3[%c3, %c0_14, %c0_15] : memref<8x8x128xbf16, #tpu.memory_space<vmem>>, vector<1x8x128xbf16>
    %38 = vector.shape_cast %37 : vector<1x8x128xbf16> to vector<8x128xbf16>
    %cst_16 = arith.constant dense<0.000000e+00> : vector<64x128xf32>
    %39 = tpu.matmul %36, %38, %cst_16 {dimension_numbers = #tpu.dot_dimension_numbers<[1], [0], [0], [1], [0, 0, 1, 1], [], []>} : vector<64x8xbf16>, vector<8x128xbf16>, vector<64x128xf32> -> vector<64x128xf32>
    %40 = arith.addf %34, %39 : vector<64x128xf32>
    %41 = vector.extract_strided_slice %11 {offsets = [0, 0, 0, 0], sizes = [9, 1, 9, 8], strides = [1, 1, 1, 1]} : vector<9x2x9x8xbf16> to vector<9x1x9x8xbf16>
    %42 = vector.shape_cast %41 : vector<9x1x9x8xbf16> to vector<9x9x8xbf16>
    %43 = vector.extract_strided_slice %42 {offsets = [1, 0, 0], sizes = [8, 8, 8], strides = [1, 1, 1]} : vector<9x9x8xbf16> to vector<8x8x8xbf16>
    %44 = vector.shape_cast %43 : vector<8x8x8xbf16> to vector<64x8xbf16>
    %c4 = arith.constant 4 : index
    %c0_17 = arith.constant 0 : index
    %c0_18 = arith.constant 0 : index
    %45 = vector.load %arg3[%c4, %c0_17, %c0_18] : memref<8x8x128xbf16, #tpu.memory_space<vmem>>, vector<1x8x128xbf16>
    %46 = vector.shape_cast %45 : vector<1x8x128xbf16> to vector<8x128xbf16>
    %cst_19 = arith.constant dense<0.000000e+00> : vector<64x128xf32>
    %47 = tpu.matmul %44, %46, %cst_19 {dimension_numbers = #tpu.dot_dimension_numbers<[1], [0], [0], [1], [0, 0, 1, 1], [], []>} : vector<64x8xbf16>, vector<8x128xbf16>, vector<64x128xf32> -> vector<64x128xf32>
    %48 = arith.addf %40, %47 : vector<64x128xf32>
    %49 = vector.extract_strided_slice %42 {offsets = [1, 1, 0], sizes = [8, 8, 8], strides = [1, 1, 1]} : vector<9x9x8xbf16> to vector<8x8x8xbf16>
    %50 = vector.shape_cast %49 : vector<8x8x8xbf16> to vector<64x8xbf16>
    %c5 = arith.constant 5 : index
    %c0_20 = arith.constant 0 : index
    %c0_21 = arith.constant 0 : index
    %51 = vector.load %arg3[%c5, %c0_20, %c0_21] : memref<8x8x128xbf16, #tpu.memory_space<vmem>>, vector<1x8x128xbf16>
    %52 = vector.shape_cast %51 : vector<1x8x128xbf16> to vector<8x128xbf16>
    %cst_22 = arith.constant dense<0.000000e+00> : vector<64x128xf32>
    %53 = tpu.matmul %50, %52, %cst_22 {dimension_numbers = #tpu.dot_dimension_numbers<[1], [0], [0], [1], [0, 0, 1, 1], [], []>} : vector<64x8xbf16>, vector<8x128xbf16>, vector<64x128xf32> -> vector<64x128xf32>
    %54 = arith.addf %48, %53 : vector<64x128xf32>
    %55 = vector.extract_strided_slice %11 {offsets = [0, 1, 0, 0], sizes = [9, 1, 9, 8], strides = [1, 1, 1, 1]} : vector<9x2x9x8xbf16> to vector<9x1x9x8xbf16>
    %56 = vector.shape_cast %55 : vector<9x1x9x8xbf16> to vector<9x9x8xbf16>
    %57 = vector.extract_strided_slice %56 {offsets = [1, 0, 0], sizes = [8, 8, 8], strides = [1, 1, 1]} : vector<9x9x8xbf16> to vector<8x8x8xbf16>
    %58 = vector.shape_cast %57 : vector<8x8x8xbf16> to vector<64x8xbf16>
    %c6 = arith.constant 6 : index
    %c0_23 = arith.constant 0 : index
    %c0_24 = arith.constant 0 : index
    %59 = vector.load %arg3[%c6, %c0_23, %c0_24] : memref<8x8x128xbf16, #tpu.memory_space<vmem>>, vector<1x8x128xbf16>
    %60 = vector.shape_cast %59 : vector<1x8x128xbf16> to vector<8x128xbf16>
    %cst_25 = arith.constant dense<0.000000e+00> : vector<64x128xf32>
    %61 = tpu.matmul %58, %60, %cst_25 {dimension_numbers = #tpu.dot_dimension_numbers<[1], [0], [0], [1], [0, 0, 1, 1], [], []>} : vector<64x8xbf16>, vector<8x128xbf16>, vector<64x128xf32> -> vector<64x128xf32>
    %62 = arith.addf %54, %61 : vector<64x128xf32>
    %63 = vector.extract_strided_slice %56 {offsets = [1, 1, 0], sizes = [8, 8, 8], strides = [1, 1, 1]} : vector<9x9x8xbf16> to vector<8x8x8xbf16>
    %64 = vector.shape_cast %63 : vector<8x8x8xbf16> to vector<64x8xbf16>
    %c7 = arith.constant 7 : index
    %c0_26 = arith.constant 0 : index
    %c0_27 = arith.constant 0 : index
    %65 = vector.load %arg3[%c7, %c0_26, %c0_27] : memref<8x8x128xbf16, #tpu.memory_space<vmem>>, vector<1x8x128xbf16>
    %66 = vector.shape_cast %65 : vector<1x8x128xbf16> to vector<8x128xbf16>
    %cst_28 = arith.constant dense<0.000000e+00> : vector<64x128xf32>
    %67 = tpu.matmul %64, %66, %cst_28 {dimension_numbers = #tpu.dot_dimension_numbers<[1], [0], [0], [1], [0, 0, 1, 1], [], []>} : vector<64x8xbf16>, vector<8x128xbf16>, vector<64x128xf32> -> vector<64x128xf32>
    %68 = arith.addf %62, %67 : vector<64x128xf32>
    %cst_29 = arith.constant dense<0.000000e+00> : vector<128xf32>
    %69 = vector.multi_reduction <add>, %68, %cst_29 [0] : vector<64x128xf32> to vector<128xf32>
    %70 = vector.shape_cast %69 : vector<128xf32> to vector<1x128xf32>
    %71 = arith.mulf %68, %68 : vector<64x128xf32>
    %cst_30 = arith.constant dense<0.000000e+00> : vector<128xf32>
    %72 = vector.multi_reduction <add>, %71, %cst_30 [0] : vector<64x128xf32> to vector<128xf32>
    %73 = vector.shape_cast %72 : vector<128xf32> to vector<1x128xf32>
    %74 = tpu.concatenate %70, %73 in 0 : vector<1x128xf32>, vector<1x128xf32> -> vector<2x128xf32>
    %c0_31 = arith.constant 0 : index
    %c0_32 = arith.constant 0 : index
    %c0_33 = arith.constant 0 : index
    %c0_34 = arith.constant 0 : index
    %75 = vector.load %arg5[%c0_31, %c0_32, %c0_33, %c0_34] : memref<1x1x2x128xf32, #tpu.memory_space<vmem>>, vector<1x1x2x128xf32>
    %76 = vector.shape_cast %75 : vector<1x1x2x128xf32> to vector<2x128xf32>
    %77 = vector.shape_cast %74 : vector<2x128xf32> to vector<1x1x2x128xf32>
    tpu.vector_store %arg5[%c0_31, %c0_32, %c0_33, %c0_34], %77 {strides = array<i32>} : memref<1x1x2x128xf32, #tpu.memory_space<vmem>>, vector<1x1x2x128xf32>,
    %78 = vector.shape_cast %68 : vector<64x128xf32> to vector<8x8x128xf32>
    %79 = vector.extract_strided_slice %78 {offsets = [0, 0, 0], sizes = [8, 8, 8], strides = [1, 1, 1]} : vector<8x8x128xf32> to vector<8x8x8xf32>
    %80 = arith.truncf %79 : vector<8x8x8xf32> to vector<8x8x8xbf16>
    %c0_35 = arith.constant 0 : index
    %c0_36 = arith.constant 0 : index
    %c0_37 = arith.constant 0 : index
    %c0_38 = arith.constant 0 : index
    %81 = vector.load %arg4[%c0_35, %c0_36, %c0_37, %c0_38] : memref<1x8x8x8xbf16, #tpu.memory_space<vmem>>, vector<1x8x8x8xbf16>
    %82 = vector.shape_cast %81 : vector<1x8x8x8xbf16> to vector<8x8x8xbf16>
    %83 = vector.shape_cast %80 : vector<8x8x8xbf16> to vector<1x8x8x8xbf16>
    tpu.vector_store %arg4[%c0_35, %c0_36, %c0_37, %c0_38], %83 {strides = array<i32>} : memref<1x8x8x8xbf16, #tpu.memory_space<vmem>>, vector<1x8x8x8xbf16>,
    return
  }
  func.func @transform_0(%arg0: i32, %arg1: i32) -> (i32, i32, i32, i32) {
    %c0_i32 = arith.constant 0 : i32
    %c0_i32_0 = arith.constant 0 : i32
    %c0_i32_1 = arith.constant 0 : i32
    %c0_i32_2 = arith.constant 0 : i32
    return %arg0, %c0_i32, %c0_i32_0, %c0_i32_1 : i32, i32, i32, i32
  }
  func.func @transform_1(%arg0: i32, %arg1: i32) -> (i32, i32, i32) {
    %c0_i32 = arith.constant 0 : i32
    %c0_i32_0 = arith.constant 0 : i32
    %c0_i32_1 = arith.constant 0 : i32
    %c0_i32_2 = arith.constant 0 : i32
    return %c0_i32, %c0_i32_0, %c0_i32_1 : i32, i32, i32
  }
  func.func @transform_2(%arg0: i32, %arg1: i32) -> (i32, i32, i32, i32) {
    %c0_i32 = arith.constant 0 : i32
    %c0_i32_0 = arith.constant 0 : i32
    %c0_i32_1 = arith.constant 0 : i32
    return %arg0, %arg1, %c0_i32, %c0_i32_0 : i32, i32, i32, i32
  }
  func.func @transform_3(%arg0: i32, %arg1: i32) -> (i32, i32, i32, i32) {
    %c0_i32 = arith.constant 0 : i32
    %c0_i32_0 = arith.constant 0 : i32
    %c0_i32_1 = arith.constant 0 : i32
    return %arg0, %arg1, %c0_i32, %c0_i32_0 : i32, i32, i32, i32
  }
}

module attributes {stable_mosaic.version = 11 : i64} {
  func.func @_bn_apply_kernel(%arg0: i32, %arg1: memref<8x128xbf16, #tpu.memory_space<vmem>>, %arg2: memref<1x128xf32, #tpu.memory_space<vmem>>, %arg3: memref<1x128xf32, #tpu.memory_space<vmem>>, %arg4: memref<8x128xbf16, #tpu.memory_space<vmem>>) attributes {dimension_semantics = [#tpu.dimension_semantics<parallel>], iteration_bounds = array<i64: 1>, scalar_prefetch = 0 : i64, scratch_operands = 0 : i64, tpu.core_type = #tpu.core_type<tc>, window_params = [{transform_indices = @transform_0, window_bounds = array<i64: 8, 128>}, {pipeline_mode = #tpu.pipeline_mode<synchronous>, transform_indices = @transform_1, window_bounds = array<i64: 1, 128>}, {pipeline_mode = #tpu.pipeline_mode<synchronous>, transform_indices = @transform_2, window_bounds = array<i64: 1, 128>}, {transform_indices = @transform_3, window_bounds = array<i64: 8, 128>}]} {
    %c0 = arith.constant 0 : index
    %c0_0 = arith.constant 0 : index
    %0 = vector.load %arg1[%c0, %c0_0] : memref<8x128xbf16, #tpu.memory_space<vmem>>, vector<8x128xbf16>
    %1 = arith.extf %0 : vector<8x128xbf16> to vector<8x128xf32>
    %c0_1 = arith.constant 0 : index
    %c0_2 = arith.constant 0 : index
    %2 = vector.load %arg2[%c0_1, %c0_2] : memref<1x128xf32, #tpu.memory_space<vmem>>, vector<1x128xf32>
    %3 = vector.broadcast %2 : vector<1x128xf32> to vector<8x128xf32>
    %4 = arith.mulf %1, %3 : vector<8x128xf32>
    %c0_3 = arith.constant 0 : index
    %c0_4 = arith.constant 0 : index
    %5 = vector.load %arg3[%c0_3, %c0_4] : memref<1x128xf32, #tpu.memory_space<vmem>>, vector<1x128xf32>
    %6 = vector.broadcast %5 : vector<1x128xf32> to vector<8x128xf32>
    %7 = arith.addf %4, %6 : vector<8x128xf32>
    %8 = arith.truncf %7 : vector<8x128xf32> to vector<8x128xbf16>
    %c0_5 = arith.constant 0 : index
    %c0_6 = arith.constant 0 : index
    %9 = vector.load %arg4[%c0_5, %c0_6] : memref<8x128xbf16, #tpu.memory_space<vmem>>, vector<8x128xbf16>
    tpu.vector_store %arg4[%c0_5, %c0_6], %8 {strides = array<i32>} : memref<8x128xbf16, #tpu.memory_space<vmem>>, vector<8x128xbf16>,
    return
  }
  func.func @transform_0(%arg0: i32) -> (i32, i32) {
    %c0_i32 = arith.constant 0 : i32
    %c0_i32_0 = arith.constant 0 : i32
    return %arg0, %c0_i32 : i32, i32
  }
  func.func @transform_1(%arg0: i32) -> (i32, i32) {
    %c0_i32 = arith.constant 0 : i32
    %c0_i32_0 = arith.constant 0 : i32
    %c0_i32_1 = arith.constant 0 : i32
    return %c0_i32, %c0_i32_0 : i32, i32
  }
  func.func @transform_2(%arg0: i32) -> (i32, i32) {
    %c0_i32 = arith.constant 0 : i32
    %c0_i32_0 = arith.constant 0 : i32
    %c0_i32_1 = arith.constant 0 : i32
    return %c0_i32, %c0_i32_0 : i32, i32
  }
  func.func @transform_3(%arg0: i32) -> (i32, i32) {
    %c0_i32 = arith.constant 0 : i32
    %c0_i32_0 = arith.constant 0 : i32
    return %arg0, %c0_i32 : i32, i32
  }
}

module attributes {stable_mosaic.version = 11 : i64} {
  func.func @_bn_apply_kernel(%arg0: i32, %arg1: memref<16x128xbf16, #tpu.memory_space<vmem>>, %arg2: memref<1x128xf32, #tpu.memory_space<vmem>>, %arg3: memref<1x128xf32, #tpu.memory_space<vmem>>, %arg4: memref<16x128xbf16, #tpu.memory_space<vmem>>) attributes {dimension_semantics = [#tpu.dimension_semantics<parallel>], iteration_bounds = array<i64: 1>, scalar_prefetch = 0 : i64, scratch_operands = 0 : i64, tpu.core_type = #tpu.core_type<tc>, window_params = [{transform_indices = @transform_0, window_bounds = array<i64: 16, 128>}, {pipeline_mode = #tpu.pipeline_mode<synchronous>, transform_indices = @transform_1, window_bounds = array<i64: 1, 128>}, {pipeline_mode = #tpu.pipeline_mode<synchronous>, transform_indices = @transform_2, window_bounds = array<i64: 1, 128>}, {transform_indices = @transform_3, window_bounds = array<i64: 16, 128>}]} {
    %c0 = arith.constant 0 : index
    %c0_0 = arith.constant 0 : index
    %0 = vector.load %arg1[%c0, %c0_0] : memref<16x128xbf16, #tpu.memory_space<vmem>>, vector<16x128xbf16>
    %1 = arith.extf %0 : vector<16x128xbf16> to vector<16x128xf32>
    %c0_1 = arith.constant 0 : index
    %c0_2 = arith.constant 0 : index
    %2 = vector.load %arg2[%c0_1, %c0_2] : memref<1x128xf32, #tpu.memory_space<vmem>>, vector<1x128xf32>
    %3 = vector.broadcast %2 : vector<1x128xf32> to vector<16x128xf32>
    %4 = arith.mulf %1, %3 : vector<16x128xf32>
    %c0_3 = arith.constant 0 : index
    %c0_4 = arith.constant 0 : index
    %5 = vector.load %arg3[%c0_3, %c0_4] : memref<1x128xf32, #tpu.memory_space<vmem>>, vector<1x128xf32>
    %6 = vector.broadcast %5 : vector<1x128xf32> to vector<16x128xf32>
    %7 = arith.addf %4, %6 : vector<16x128xf32>
    %8 = arith.truncf %7 : vector<16x128xf32> to vector<16x128xbf16>
    %c0_5 = arith.constant 0 : index
    %c0_6 = arith.constant 0 : index
    %9 = vector.load %arg4[%c0_5, %c0_6] : memref<16x128xbf16, #tpu.memory_space<vmem>>, vector<16x128xbf16>
    tpu.vector_store %arg4[%c0_5, %c0_6], %8 {strides = array<i32>} : memref<16x128xbf16, #tpu.memory_space<vmem>>, vector<16x128xbf16>,
    return
  }
  func.func @transform_0(%arg0: i32) -> (i32, i32) {
    %c0_i32 = arith.constant 0 : i32
    %c0_i32_0 = arith.constant 0 : i32
    return %arg0, %c0_i32 : i32, i32
  }
  func.func @transform_1(%arg0: i32) -> (i32, i32) {
    %c0_i32 = arith.constant 0 : i32
    %c0_i32_0 = arith.constant 0 : i32
    %c0_i32_1 = arith.constant 0 : i32
    return %c0_i32, %c0_i32_0 : i32, i32
  }
  func.func @transform_2(%arg0: i32) -> (i32, i32) {
    %c0_i32 = arith.constant 0 : i32
    %c0_i32_0 = arith.constant 0 : i32
    %c0_i32_1 = arith.constant 0 : i32
    return %c0_i32, %c0_i32_0 : i32, i32
  }
  func.func @transform_3(%arg0: i32) -> (i32, i32) {
    %c0_i32 = arith.constant 0 : i32
    %c0_i32_0 = arith.constant 0 : i32
    return %arg0, %c0_i32 : i32, i32
  }
}

module attributes {stable_mosaic.version = 11 : i64} {
  func.func @_up_conv_kernel(%arg0: i32, %arg1: i32, %arg2: memref<1x10x10x16xbf16, #tpu.memory_space<vmem>>, %arg3: memref<12x16x128xbf16, #tpu.memory_space<vmem>>, %arg4: memref<1x16x8x8xbf16, #tpu.memory_space<vmem>>, %arg5: memref<1x1x2x128xf32, #tpu.memory_space<vmem>>) attributes {dimension_semantics = [#tpu.dimension_semantics<parallel>, #tpu.dimension_semantics<parallel>], iteration_bounds = array<i64: 2, 1>, scalar_prefetch = 0 : i64, scratch_operands = 0 : i64, tpu.core_type = #tpu.core_type<tc>, window_params = [{transform_indices = @transform_0, window_bounds = array<i64: 1, 10, 10, 16>}, {pipeline_mode = #tpu.pipeline_mode<synchronous>, transform_indices = @transform_1, window_bounds = array<i64: 12, 16, 128>}, {transform_indices = @transform_2, window_bounds = array<i64: 1, 16, 8, 8>}, {transform_indices = @transform_3, window_bounds = array<i64: 1, 1, 2, 128>}]} {
    %c8_i32 = arith.constant 8 : i32
    %0 = arith.muli %arg1, %c8_i32 : i32
    %1 = tpu.assume_multiple %0, 8 : i32
    %c0 = arith.constant 0 : index
    %2 = arith.index_cast %1 : i32 to index
    %c0_0 = arith.constant 0 : index
    %c0_1 = arith.constant 0 : index
    %3 = vector.load %arg2[%c0, %2, %c0_0, %c0_1] : memref<1x10x10x16xbf16, #tpu.memory_space<vmem>>, vector<1x10x10x16xbf16>
    %4 = vector.shape_cast %3 : vector<1x10x10x16xbf16> to vector<10x10x16xbf16>
    %5 = arith.extf %4 : vector<10x10x16xbf16> to vector<10x10x16xf32>
    %cst = arith.constant 0.000000e+00 : f32
    %6 = vector.broadcast %cst : f32 to vector<10x10x16xf32>
    %7 = arith.maximumf %5, %6 : vector<10x10x16xf32>
    %8 = arith.truncf %7 : vector<10x10x16xf32> to vector<10x10x16xbf16>
    %cst_2 = arith.constant 0.000000e+00 : f32
    %9 = vector.broadcast %cst_2 : f32 to vector<1x128xf32>
    %cst_3 = arith.constant 0.000000e+00 : f32
    %10 = vector.broadcast %cst_3 : f32 to vector<1x128xf32>
    %cst_4 = arith.constant 0.000000e+00 : f32
    %11 = vector.broadcast %cst_4 : f32 to vector<64x128xf32>
    %12 = vector.extract_strided_slice %8 {offsets = [0, 0, 0], sizes = [8, 8, 16], strides = [1, 1, 1]} : vector<10x10x16xbf16> to vector<8x8x16xbf16>
    %13 = vector.shape_cast %12 : vector<8x8x16xbf16> to vector<64x16xbf16>
    %c0_5 = arith.constant 0 : index
    %c0_6 = arith.constant 0 : index
    %c0_7 = arith.constant 0 : index
    %14 = vector.load %arg3[%c0_5, %c0_6, %c0_7] : memref<12x16x128xbf16, #tpu.memory_space<vmem>>, vector<1x16x128xbf16>
    %15 = vector.shape_cast %14 : vector<1x16x128xbf16> to vector<16x128xbf16>
    %cst_8 = arith.constant dense<0.000000e+00> : vector<64x128xf32>
    %16 = tpu.matmul %13, %15, %cst_8 {dimension_numbers = #tpu.dot_dimension_numbers<[1], [0], [0], [1], [0, 0, 1, 1], [], []>} : vector<64x16xbf16>, vector<16x128xbf16>, vector<64x128xf32> -> vector<64x128xf32>
    %17 = arith.addf %11, %16 : vector<64x128xf32>
    %18 = vector.extract_strided_slice %8 {offsets = [0, 1, 0], sizes = [8, 8, 16], strides = [1, 1, 1]} : vector<10x10x16xbf16> to vector<8x8x16xbf16>
    %19 = vector.shape_cast %18 : vector<8x8x16xbf16> to vector<64x16xbf16>
    %c1 = arith.constant 1 : index
    %c0_9 = arith.constant 0 : index
    %c0_10 = arith.constant 0 : index
    %20 = vector.load %arg3[%c1, %c0_9, %c0_10] : memref<12x16x128xbf16, #tpu.memory_space<vmem>>, vector<1x16x128xbf16>
    %21 = vector.shape_cast %20 : vector<1x16x128xbf16> to vector<16x128xbf16>
    %cst_11 = arith.constant dense<0.000000e+00> : vector<64x128xf32>
    %22 = tpu.matmul %19, %21, %cst_11 {dimension_numbers = #tpu.dot_dimension_numbers<[1], [0], [0], [1], [0, 0, 1, 1], [], []>} : vector<64x16xbf16>, vector<16x128xbf16>, vector<64x128xf32> -> vector<64x128xf32>
    %23 = arith.addf %17, %22 : vector<64x128xf32>
    %24 = vector.extract_strided_slice %8 {offsets = [0, 2, 0], sizes = [8, 8, 16], strides = [1, 1, 1]} : vector<10x10x16xbf16> to vector<8x8x16xbf16>
    %25 = vector.shape_cast %24 : vector<8x8x16xbf16> to vector<64x16xbf16>
    %c2 = arith.constant 2 : index
    %c0_12 = arith.constant 0 : index
    %c0_13 = arith.constant 0 : index
    %26 = vector.load %arg3[%c2, %c0_12, %c0_13] : memref<12x16x128xbf16, #tpu.memory_space<vmem>>, vector<1x16x128xbf16>
    %27 = vector.shape_cast %26 : vector<1x16x128xbf16> to vector<16x128xbf16>
    %cst_14 = arith.constant dense<0.000000e+00> : vector<64x128xf32>
    %28 = tpu.matmul %25, %27, %cst_14 {dimension_numbers = #tpu.dot_dimension_numbers<[1], [0], [0], [1], [0, 0, 1, 1], [], []>} : vector<64x16xbf16>, vector<16x128xbf16>, vector<64x128xf32> -> vector<64x128xf32>
    %29 = arith.addf %23, %28 : vector<64x128xf32>
    %30 = vector.extract_strided_slice %8 {offsets = [1, 0, 0], sizes = [8, 8, 16], strides = [1, 1, 1]} : vector<10x10x16xbf16> to vector<8x8x16xbf16>
    %31 = vector.shape_cast %30 : vector<8x8x16xbf16> to vector<64x16xbf16>
    %c3 = arith.constant 3 : index
    %c0_15 = arith.constant 0 : index
    %c0_16 = arith.constant 0 : index
    %32 = vector.load %arg3[%c3, %c0_15, %c0_16] : memref<12x16x128xbf16, #tpu.memory_space<vmem>>, vector<1x16x128xbf16>
    %33 = vector.shape_cast %32 : vector<1x16x128xbf16> to vector<16x128xbf16>
    %cst_17 = arith.constant dense<0.000000e+00> : vector<64x128xf32>
    %34 = tpu.matmul %31, %33, %cst_17 {dimension_numbers = #tpu.dot_dimension_numbers<[1], [0], [0], [1], [0, 0, 1, 1], [], []>} : vector<64x16xbf16>, vector<16x128xbf16>, vector<64x128xf32> -> vector<64x128xf32>
    %35 = arith.addf %29, %34 : vector<64x128xf32>
    %36 = vector.extract_strided_slice %8 {offsets = [1, 1, 0], sizes = [8, 8, 16], strides = [1, 1, 1]} : vector<10x10x16xbf16> to vector<8x8x16xbf16>
    %37 = vector.shape_cast %36 : vector<8x8x16xbf16> to vector<64x16xbf16>
    %c4 = arith.constant 4 : index
    %c0_18 = arith.constant 0 : index
    %c0_19 = arith.constant 0 : index
    %38 = vector.load %arg3[%c4, %c0_18, %c0_19] : memref<12x16x128xbf16, #tpu.memory_space<vmem>>, vector<1x16x128xbf16>
    %39 = vector.shape_cast %38 : vector<1x16x128xbf16> to vector<16x128xbf16>
    %cst_20 = arith.constant dense<0.000000e+00> : vector<64x128xf32>
    %40 = tpu.matmul %37, %39, %cst_20 {dimension_numbers = #tpu.dot_dimension_numbers<[1], [0], [0], [1], [0, 0, 1, 1], [], []>} : vector<64x16xbf16>, vector<16x128xbf16>, vector<64x128xf32> -> vector<64x128xf32>
    %41 = arith.addf %35, %40 : vector<64x128xf32>
    %42 = vector.extract_strided_slice %8 {offsets = [1, 2, 0], sizes = [8, 8, 16], strides = [1, 1, 1]} : vector<10x10x16xbf16> to vector<8x8x16xbf16>
    %43 = vector.shape_cast %42 : vector<8x8x16xbf16> to vector<64x16xbf16>
    %c5 = arith.constant 5 : index
    %c0_21 = arith.constant 0 : index
    %c0_22 = arith.constant 0 : index
    %44 = vector.load %arg3[%c5, %c0_21, %c0_22] : memref<12x16x128xbf16, #tpu.memory_space<vmem>>, vector<1x16x128xbf16>
    %45 = vector.shape_cast %44 : vector<1x16x128xbf16> to vector<16x128xbf16>
    %cst_23 = arith.constant dense<0.000000e+00> : vector<64x128xf32>
    %46 = tpu.matmul %43, %45, %cst_23 {dimension_numbers = #tpu.dot_dimension_numbers<[1], [0], [0], [1], [0, 0, 1, 1], [], []>} : vector<64x16xbf16>, vector<16x128xbf16>, vector<64x128xf32> -> vector<64x128xf32>
    %47 = arith.addf %41, %46 : vector<64x128xf32>
    %cst_24 = arith.constant dense<0.000000e+00> : vector<128xf32>
    %48 = vector.multi_reduction <add>, %47, %cst_24 [0] : vector<64x128xf32> to vector<128xf32>
    %49 = vector.shape_cast %48 : vector<128xf32> to vector<1x128xf32>
    %50 = arith.addf %9, %49 : vector<1x128xf32>
    %51 = arith.mulf %47, %47 : vector<64x128xf32>
    %cst_25 = arith.constant dense<0.000000e+00> : vector<128xf32>
    %52 = vector.multi_reduction <add>, %51, %cst_25 [0] : vector<64x128xf32> to vector<128xf32>
    %53 = vector.shape_cast %52 : vector<128xf32> to vector<1x128xf32>
    %54 = arith.addf %10, %53 : vector<1x128xf32>
    %55 = vector.shape_cast %47 : vector<64x128xf32> to vector<8x8x128xf32>
    %56 = vector.extract_strided_slice %55 {offsets = [0, 0, 0], sizes = [8, 8, 8], strides = [1, 1, 1]} : vector<8x8x128xf32> to vector<8x8x8xf32>
    %cst_26 = arith.constant 0.000000e+00 : f32
    %57 = vector.broadcast %cst_26 : f32 to vector<64x128xf32>
    %58 = vector.extract_strided_slice %8 {offsets = [1, 0, 0], sizes = [8, 8, 16], strides = [1, 1, 1]} : vector<10x10x16xbf16> to vector<8x8x16xbf16>
    %59 = vector.shape_cast %58 : vector<8x8x16xbf16> to vector<64x16xbf16>
    %c6 = arith.constant 6 : index
    %c0_27 = arith.constant 0 : index
    %c0_28 = arith.constant 0 : index
    %60 = vector.load %arg3[%c6, %c0_27, %c0_28] : memref<12x16x128xbf16, #tpu.memory_space<vmem>>, vector<1x16x128xbf16>
    %61 = vector.shape_cast %60 : vector<1x16x128xbf16> to vector<16x128xbf16>
    %cst_29 = arith.constant dense<0.000000e+00> : vector<64x128xf32>
    %62 = tpu.matmul %59, %61, %cst_29 {dimension_numbers = #tpu.dot_dimension_numbers<[1], [0], [0], [1], [0, 0, 1, 1], [], []>} : vector<64x16xbf16>, vector<16x128xbf16>, vector<64x128xf32> -> vector<64x128xf32>
    %63 = arith.addf %57, %62 : vector<64x128xf32>
    %64 = vector.extract_strided_slice %8 {offsets = [1, 1, 0], sizes = [8, 8, 16], strides = [1, 1, 1]} : vector<10x10x16xbf16> to vector<8x8x16xbf16>
    %65 = vector.shape_cast %64 : vector<8x8x16xbf16> to vector<64x16xbf16>
    %c7 = arith.constant 7 : index
    %c0_30 = arith.constant 0 : index
    %c0_31 = arith.constant 0 : index
    %66 = vector.load %arg3[%c7, %c0_30, %c0_31] : memref<12x16x128xbf16, #tpu.memory_space<vmem>>, vector<1x16x128xbf16>
    %67 = vector.shape_cast %66 : vector<1x16x128xbf16> to vector<16x128xbf16>
    %cst_32 = arith.constant dense<0.000000e+00> : vector<64x128xf32>
    %68 = tpu.matmul %65, %67, %cst_32 {dimension_numbers = #tpu.dot_dimension_numbers<[1], [0], [0], [1], [0, 0, 1, 1], [], []>} : vector<64x16xbf16>, vector<16x128xbf16>, vector<64x128xf32> -> vector<64x128xf32>
    %69 = arith.addf %63, %68 : vector<64x128xf32>
    %70 = vector.extract_strided_slice %8 {offsets = [1, 2, 0], sizes = [8, 8, 16], strides = [1, 1, 1]} : vector<10x10x16xbf16> to vector<8x8x16xbf16>
    %71 = vector.shape_cast %70 : vector<8x8x16xbf16> to vector<64x16xbf16>
    %c8 = arith.constant 8 : index
    %c0_33 = arith.constant 0 : index
    %c0_34 = arith.constant 0 : index
    %72 = vector.load %arg3[%c8, %c0_33, %c0_34] : memref<12x16x128xbf16, #tpu.memory_space<vmem>>, vector<1x16x128xbf16>
    %73 = vector.shape_cast %72 : vector<1x16x128xbf16> to vector<16x128xbf16>
    %cst_35 = arith.constant dense<0.000000e+00> : vector<64x128xf32>
    %74 = tpu.matmul %71, %73, %cst_35 {dimension_numbers = #tpu.dot_dimension_numbers<[1], [0], [0], [1], [0, 0, 1, 1], [], []>} : vector<64x16xbf16>, vector<16x128xbf16>, vector<64x128xf32> -> vector<64x128xf32>
    %75 = arith.addf %69, %74 : vector<64x128xf32>
    %76 = vector.extract_strided_slice %8 {offsets = [2, 0, 0], sizes = [8, 8, 16], strides = [1, 1, 1]} : vector<10x10x16xbf16> to vector<8x8x16xbf16>
    %77 = vector.shape_cast %76 : vector<8x8x16xbf16> to vector<64x16xbf16>
    %c9 = arith.constant 9 : index
    %c0_36 = arith.constant 0 : index
    %c0_37 = arith.constant 0 : index
    %78 = vector.load %arg3[%c9, %c0_36, %c0_37] : memref<12x16x128xbf16, #tpu.memory_space<vmem>>, vector<1x16x128xbf16>
    %79 = vector.shape_cast %78 : vector<1x16x128xbf16> to vector<16x128xbf16>
    %cst_38 = arith.constant dense<0.000000e+00> : vector<64x128xf32>
    %80 = tpu.matmul %77, %79, %cst_38 {dimension_numbers = #tpu.dot_dimension_numbers<[1], [0], [0], [1], [0, 0, 1, 1], [], []>} : vector<64x16xbf16>, vector<16x128xbf16>, vector<64x128xf32> -> vector<64x128xf32>
    %81 = arith.addf %75, %80 : vector<64x128xf32>
    %82 = vector.extract_strided_slice %8 {offsets = [2, 1, 0], sizes = [8, 8, 16], strides = [1, 1, 1]} : vector<10x10x16xbf16> to vector<8x8x16xbf16>
    %83 = vector.shape_cast %82 : vector<8x8x16xbf16> to vector<64x16xbf16>
    %c10 = arith.constant 10 : index
    %c0_39 = arith.constant 0 : index
    %c0_40 = arith.constant 0 : index
    %84 = vector.load %arg3[%c10, %c0_39, %c0_40] : memref<12x16x128xbf16, #tpu.memory_space<vmem>>, vector<1x16x128xbf16>
    %85 = vector.shape_cast %84 : vector<1x16x128xbf16> to vector<16x128xbf16>
    %cst_41 = arith.constant dense<0.000000e+00> : vector<64x128xf32>
    %86 = tpu.matmul %83, %85, %cst_41 {dimension_numbers = #tpu.dot_dimension_numbers<[1], [0], [0], [1], [0, 0, 1, 1], [], []>} : vector<64x16xbf16>, vector<16x128xbf16>, vector<64x128xf32> -> vector<64x128xf32>
    %87 = arith.addf %81, %86 : vector<64x128xf32>
    %88 = vector.extract_strided_slice %8 {offsets = [2, 2, 0], sizes = [8, 8, 16], strides = [1, 1, 1]} : vector<10x10x16xbf16> to vector<8x8x16xbf16>
    %89 = vector.shape_cast %88 : vector<8x8x16xbf16> to vector<64x16xbf16>
    %c11 = arith.constant 11 : index
    %c0_42 = arith.constant 0 : index
    %c0_43 = arith.constant 0 : index
    %90 = vector.load %arg3[%c11, %c0_42, %c0_43] : memref<12x16x128xbf16, #tpu.memory_space<vmem>>, vector<1x16x128xbf16>
    %91 = vector.shape_cast %90 : vector<1x16x128xbf16> to vector<16x128xbf16>
    %cst_44 = arith.constant dense<0.000000e+00> : vector<64x128xf32>
    %92 = tpu.matmul %89, %91, %cst_44 {dimension_numbers = #tpu.dot_dimension_numbers<[1], [0], [0], [1], [0, 0, 1, 1], [], []>} : vector<64x16xbf16>, vector<16x128xbf16>, vector<64x128xf32> -> vector<64x128xf32>
    %93 = arith.addf %87, %92 : vector<64x128xf32>
    %cst_45 = arith.constant dense<0.000000e+00> : vector<128xf32>
    %94 = vector.multi_reduction <add>, %93, %cst_45 [0] : vector<64x128xf32> to vector<128xf32>
    %95 = vector.shape_cast %94 : vector<128xf32> to vector<1x128xf32>
    %96 = arith.addf %50, %95 : vector<1x128xf32>
    %97 = arith.mulf %93, %93 : vector<64x128xf32>
    %cst_46 = arith.constant dense<0.000000e+00> : vector<128xf32>
    %98 = vector.multi_reduction <add>, %97, %cst_46 [0] : vector<64x128xf32> to vector<128xf32>
    %99 = vector.shape_cast %98 : vector<128xf32> to vector<1x128xf32>
    %100 = arith.addf %54, %99 : vector<1x128xf32>
    %101 = vector.shape_cast %93 : vector<64x128xf32> to vector<8x8x128xf32>
    %102 = vector.extract_strided_slice %101 {offsets = [0, 0, 0], sizes = [8, 8, 8], strides = [1, 1, 1]} : vector<8x8x128xf32> to vector<8x8x8xf32>
    %103 = tpu.concatenate %96, %100 in 0 : vector<1x128xf32>, vector<1x128xf32> -> vector<2x128xf32>
    %c0_47 = arith.constant 0 : index
    %c0_48 = arith.constant 0 : index
    %c0_49 = arith.constant 0 : index
    %c0_50 = arith.constant 0 : index
    %104 = vector.load %arg5[%c0_47, %c0_48, %c0_49, %c0_50] : memref<1x1x2x128xf32, #tpu.memory_space<vmem>>, vector<1x1x2x128xf32>
    %105 = vector.shape_cast %104 : vector<1x1x2x128xf32> to vector<2x128xf32>
    %106 = vector.shape_cast %103 : vector<2x128xf32> to vector<1x1x2x128xf32>
    tpu.vector_store %arg5[%c0_47, %c0_48, %c0_49, %c0_50], %106 {strides = array<i32>} : memref<1x1x2x128xf32, #tpu.memory_space<vmem>>, vector<1x1x2x128xf32>,
    %107 = vector.shape_cast %56 : vector<8x8x8xf32> to vector<8x1x8x8xf32>
    %108 = vector.shape_cast %102 : vector<8x8x8xf32> to vector<8x1x8x8xf32>
    %109 = tpu.concatenate %107, %108 in 1 : vector<8x1x8x8xf32>, vector<8x1x8x8xf32> -> vector<8x2x8x8xf32>
    %110 = vector.shape_cast %109 : vector<8x2x8x8xf32> to vector<16x8x8xf32>
    %111 = arith.truncf %110 : vector<16x8x8xf32> to vector<16x8x8xbf16>
    %c0_51 = arith.constant 0 : index
    %c0_52 = arith.constant 0 : index
    %c0_53 = arith.constant 0 : index
    %c0_54 = arith.constant 0 : index
    %112 = vector.load %arg4[%c0_51, %c0_52, %c0_53, %c0_54] : memref<1x16x8x8xbf16, #tpu.memory_space<vmem>>, vector<1x16x8x8xbf16>
    %113 = vector.shape_cast %112 : vector<1x16x8x8xbf16> to vector<16x8x8xbf16>
    %114 = vector.shape_cast %111 : vector<16x8x8xbf16> to vector<1x16x8x8xbf16>
    tpu.vector_store %arg4[%c0_51, %c0_52, %c0_53, %c0_54], %114 {strides = array<i32>} : memref<1x16x8x8xbf16, #tpu.memory_space<vmem>>, vector<1x16x8x8xbf16>,
    return
  }
  func.func @transform_0(%arg0: i32, %arg1: i32) -> (i32, i32, i32, i32) {
    %c0_i32 = arith.constant 0 : i32
    %c0_i32_0 = arith.constant 0 : i32
    %c0_i32_1 = arith.constant 0 : i32
    %c0_i32_2 = arith.constant 0 : i32
    return %arg0, %c0_i32, %c0_i32_0, %c0_i32_1 : i32, i32, i32, i32
  }
  func.func @transform_1(%arg0: i32, %arg1: i32) -> (i32, i32, i32) {
    %c0_i32 = arith.constant 0 : i32
    %c0_i32_0 = arith.constant 0 : i32
    %c0_i32_1 = arith.constant 0 : i32
    %c0_i32_2 = arith.constant 0 : i32
    return %c0_i32, %c0_i32_0, %c0_i32_1 : i32, i32, i32
  }
  func.func @transform_2(%arg0: i32, %arg1: i32) -> (i32, i32, i32, i32) {
    %c0_i32 = arith.constant 0 : i32
    %c0_i32_0 = arith.constant 0 : i32
    %c0_i32_1 = arith.constant 0 : i32
    return %arg0, %arg1, %c0_i32, %c0_i32_0 : i32, i32, i32, i32
  }
  func.func @transform_3(%arg0: i32, %arg1: i32) -> (i32, i32, i32, i32) {
    %c0_i32 = arith.constant 0 : i32
    %c0_i32_0 = arith.constant 0 : i32
    %c0_i32_1 = arith.constant 0 : i32
    return %arg0, %arg1, %c0_i32, %c0_i32_0 : i32, i32, i32, i32
  }
}

</mosaic_0001>

<bundles_post_ra>
// kernel: tile.23
= control target key start
LH: loop header
LB: loop body
LE: loop exit
PB: predicated region body
PF: predicated region fallthrough
CT: control target
= control target key end

     0   :  { %s28_s0 = inlined_call_operand.vmem [shape: f32[8], index: 0, kind: input, shape index: {}]   ;;  %s29_s1 = inlined_call_operand.vmem [shape: f32[16,8], index: 1, kind: output, shape index: {}]  }
   0x1   :  { %v4_v0 = vld [vmem:[%s28_s0] ss:$0 sm:$0xff] }
   0x2   :  { %5 = vst [vmem:[%s29_s1] sm:$0xff] %v4_v0 }
   0x3   :  { %8 = vst [vmem:[%s29_s1 + $0x8] sm:$0xff] %v4_v0 }

// kernel: tile.24
= control target key start
LH: loop header
LB: loop body
LE: loop exit
PB: predicated region body
PF: predicated region fallthrough
CT: control target
= control target key end

     0   :  { %s131_s10 = smov 120   ;;  %s132_s11 = smov 104   ;;  %vm3_vm0 = vcmask 64512   ;;  %vm9_vm1 = vcmask 1048512   ;;  %vm15_vm2 = vcmask 982912   ;;  %vm21_vm3 = vcmask 917312   ;;  %s207_s0 = inlined_call_operand.vmem [shape: f32[16,8], index: 0, kind: input, shape index: {}]   ;;  %s208_s1 = inlined_call_operand.vmem [shape: f32[1,128], index: 1, kind: output, shape index: {}]  }
   0x1   :  { %v101_v0 = vld [vmem:[%s207_s0 + $0xf] sm:$0x1]   ;;  %v103_v1 = vld [vmem:[%s207_s0 + $0xd] sm:$0x1]   ;;  %v105_v2 = vld [vmem:[%s207_s0 + $0xb] sm:$0x1]  }
   0x2   :  { %7 = vrot.lane.b32.xlu0 %v101_v0, %s131_s10  ;;  %19 = vrot.lane.b32.xlu1 %v103_v1, %s132_s11  ;;  %s133_s14 = smov 88   ;;  %v102_v3 = vld [vmem:[%s207_s0 + $0xe] sm:$0x1]   ;;  %v104_v4 = vld [vmem:[%s207_s0 + $0xc] sm:$0x1]   ;;  %s134_s19 = smov 112  }
   0x3   :  { %31 = vrot.lane.b32.xlu2 %v105_v2, %s133_s14  ;;  %s135_s20 = smov 96   ;;  %v106_v5 = vld [vmem:[%s207_s0 + $0xa] sm:$0x1]   ;;  %s136_s23 = smov 80   ;;  %v107_v6 = vld [vmem:[%s207_s0 + $0x9] sm:$0x1]  }
   0x4   :  { %v108_v7 = vld [vmem:[%s207_s0 + $0x8] sm:$0x1]   ;;  %s137_s28 = smov 72   ;;  %s138_s29 = smov 64   ;;  %v109_v8 = vld [vmem:[%s207_s0 + $0x7] sm:$0x1]  }
   0x5   :  { %s139_s3 = smov 56   ;;  %v110_v9 = vld [vmem:[%s207_s0 + $0x6] sm:$0x1]   ;;  %v111_v10 = vld [vmem:[%s207_s0 + $0x5] sm:$0x1]   ;;  %s140_s8 = smov 48  }
   0x6   :  { %s141_s9 = smov 40   ;;  %v112_v11 = vld [vmem:[%s207_s0 + $0x4] sm:$0x1]   ;;  %s142_s12 = smov 32   ;;  %v113_v12 = vld [vmem:[%s207_s0 + $0x3] sm:$0x1]  }
   0x7   :  { %v114_v13 = vld [vmem:[%s207_s0 + $0x2] sm:$0x1]   ;;  %s143_s17 = smov 24   ;;  %s144_s18 = smov 16   ;;  %v115_v14 = vld [vmem:[%s207_s0 + $0x1] sm:$0x1]  }
   0x8   :  { %s145_s21 = smov 8   ;;  %v2_v15 = vld [vmem:[%s207_s0] sm:$0x1]   ;;  %vm27_vm4 = vcmask 851712   ;;  %vm33_vm5 = vcmask 786112   ;;  %vm39_vm6 = vcmask 720512  }
   0x9   :  { %4 = vst.msk [vmem:[#allocation0] sm:$0x1] %vm3_vm0, %v2_v15   ;;  %vm45_vm7 = vcmask 654912   ;;  %vm51_vm8 = vcmask 589312   ;;  %vm57_vm9 = vcmask 523712   ;;  %vm63_vm10 = vcmask 458112  }
   0xa   :  { %13 = vrot.lane.b32.xlu0 %v102_v3, %s134_s19  ;;  %25 = vrot.lane.b32.xlu1 %v104_v4, %s135_s20  ;;  %vm69_vm11 = vcmask 392512   ;;  %vm75_vm12 = vcmask 326912   ;;  %vm81_vm13 = vcmask 261312   ;;  %vm87_vm14 = vcmask 195712  }
   0xb   :  { %37 = vrot.lane.b32.xlu2 %v106_v5, %s136_s23  ;;  %vm93_vm15 = vcmask 130112  }
  0x12   :  { %43 = vrot.lane.b32.xlu0 %v107_v6, %s137_s28  ;;  %49 = vrot.lane.b32.xlu1 %v108_v7, %s138_s29 }
  0x13   :  { %55 = vrot.lane.b32.xlu2 %v109_v8, %s139_s3 }
  0x1a   :  { %61 = vrot.lane.b32.xlu0 %v110_v9, %s140_s8  ;;  %67 = vrot.lane.b32.xlu1 %v111_v10, %s141_s9 }
  0x1b   :  { %73 = vrot.lane.b32.xlu2 %v112_v11, %s142_s12 }
  0x22   :  { %79 = vrot.lane.b32.xlu0 %v113_v12, %s143_s17  ;;  %85 = vrot.lane.b32.xlu1 %v114_v13, %s144_s18 }
  0x23   :  { %91 = vrot.lane.b32.xlu2 %v115_v14, %s145_s21 }
  0x5d   :  { %v32_v16 = vpop.permute.xlu2 %31  }
  0x65   :  { %v38_v17 = vpop.permute.xlu2 %37  }
  0x6d   :  { %v56_v18 = vpop.permute.xlu2 %55  }
  0x74   :  { %v8_v19 = vpop.permute.xlu0 %7   ;;  %v20_v20 = vpop.permute.xlu1 %19  }
  0x75   :  { %10 = vst.msk [vmem:[#allocation0] sm:$0x1] %vm9_vm1, %v8_v19   ;;  %v74_v21 = vpop.permute.xlu2 %73  }
  0x7c   :  { %v14_v22 = vpop.permute.xlu0 %13   ;;  %v26_v23 = vpop.permute.xlu1 %25  }
  0x7d   :  { %16 = vst.msk [vmem:[#allocation0] sm:$0x1] %vm15_vm2, %v14_v22   ;;  %v92_v24 = vpop.permute.xlu2 %91  }
  0x7e   :  { %22 = vst.msk [vmem:[#allocation0] sm:$0x1] %vm21_vm3, %v20_v20  }
  0x7f   :  { %28 = vst.msk [vmem:[#allocation0] sm:$0x1] %vm27_vm4, %v26_v23  }
  0x80   :  { %34 = vst.msk [vmem:[#allocation0] sm:$0x1] %vm33_vm5, %v32_v16  }
  0x81   :  { %40 = vst.msk [vmem:[#allocation0] sm:$0x1] %vm39_vm6, %v38_v17  }
  0x84   :  { %v44_v25 = vpop.permute.xlu0 %43   ;;  %v50_v26 = vpop.permute.xlu1 %49  }
  0x85   :  { %46 = vst.msk [vmem:[#allocation0] sm:$0x1] %vm45_vm7, %v44_v25  }
  0x86   :  { %52 = vst.msk [vmem:[#allocation0] sm:$0x1] %vm51_vm8, %v50_v26  }
  0x87   :  { %58 = vst.msk [vmem:[#allocation0] sm:$0x1] %vm57_vm9, %v56_v18  }
  0x8c   :  { %v62_v27 = vpop.permute.xlu0 %61   ;;  %v68_v28 = vpop.permute.xlu1 %67  }
  0x8d   :  { %64 = vst.msk [vmem:[#allocation0] sm:$0x1] %vm63_vm10, %v62_v27  }
  0x8e   :  { %70 = vst.msk [vmem:[#allocation0] sm:$0x1] %vm69_vm11, %v68_v28  }
  0x8f   :  { %76 = vst.msk [vmem:[#allocation0] sm:$0x1] %vm75_vm12, %v74_v21  }
  0x94   :  { %v80_v29 = vpop.permute.xlu0 %79   ;;  %v86_v30 = vpop.permute.xlu1 %85  }
  0x95   :  { %82 = vst.msk [vmem:[#allocation0] sm:$0x1] %vm81_vm13, %v80_v29  }
  0x96   :  { %88 = vst.msk [vmem:[#allocation0] sm:$0x1] %vm87_vm14, %v86_v30  }
  0x97   :  { %94 = vst.msk [vmem:[#allocation0] sm:$0x1] %vm93_vm15, %v92_v24  }
  0x9e   :  { %v97_v31 = vld [vmem:[#allocation0] sm:$0x1] }
  0x9f   :  { %100 = vst [vmem:[%s208_s1] sm:$0x1] %v97_v31 }

// kernel: unet_block_forward.5
= control target key start
LH: loop header
LB: loop body
LE: loop exit
PB: predicated region body
PF: predicated region fallthrough
CT: control target
= control target key end

     0   :  { %s66_s0 = inlined_call_operand.vmem [shape: bf16[8,128], index: 0, kind: input, shape index: {}]   ;;  %s67_s1 = inlined_call_operand.vmem [shape: f32[1,128], index: 1, kind: input, shape index: {}]   ;;  %s68_s2 = inlined_call_operand.vmem [shape: f32[1,128], index: 2, kind: input, shape index: {}]   ;;  %s69_s3 = inlined_call_operand.vmem [shape: bf16[8,128], index: 3, kind: output, shape index: {}]  }
   0x1   :  { %v14_v0 = vld [vmem:[%s66_s0] sm:$0xf] }
   0x2   :  { %v32_v1 = vld [vmem:[%s67_s1] ss:$0 sm:$0xff]  ;;  %v15_v2 = vunpack.c.l.bf16 %v14_v0 }
   0x3   :  { %v33_v3 = vld [vmem:[%s68_s2] ss:$0 sm:$0xff] }
   0x4   :  { %v20_v4 = vmul.f32 %v32_v1, %v15_v2 }
   0x6   :  { %v25_v5 = vadd.f32 %v33_v3, %v20_v4 }
   0x8   :  { %v26_v6 = vpack.c.bf16 %v25_v5, %v25_v5 }
   0xa   :  { %27 = vst [vmem:[%s69_s3] sm:$0xf] %v26_v6 }

// kernel: unet_block_forward.4
= control target key start
LH: loop header
LB: loop body
LE: loop exit
PB: predicated region body
PF: predicated region fallthrough
CT: control target
= control target key end

     0   :  { %s1453_s12 = smov 0   ;;  %s1455_s13 = smov 0   ;;  %s1928_s0 = inlined_call_operand.vmem [shape: f32[2,18,9,8], index: 0, kind: input, shape index: {}]   ;;  %s1929_s1 = inlined_call_operand.vmem [shape: bf16[8,8,128], index: 1, kind: input, shape index: {}]   ;;  %s1930_s2 = inlined_call_operand.vmem [shape: bf16[2,8,8,8], index: 2, kind: output, shape index: {0}]   ;;  %s1931_s3 = inlined_call_operand.vmem [shape: f32[2,1,2,128], index: 3, kind: output, shape index: {1}]  }
   0x1   :  { %s1457_s14 = smov 0  }
   0x2 LB: > { %s26_s15 = sadd.s32 1, %s1427_s13  ;;  %p1337_p0 = scmp.ge.s32.totalorder %s1431_s14, 1  ;;  %s1431_s14 = sphi %s1457_s14, %s14_s14   ;;  %s1427_s13 = sphi %s1455_s13, %s1957_s13   ;;  %s1423_s12 = sphi %s1453_s12, %s1956_s12  }
   0x3   : > { %p28_p1 = scmp.ge.s32.totalorder %s26_s15, 2  ;;  %p156_p2 = scmp.lt.s32.totalorder %s1431_s14, 3 }
   0x5   : > { %s1959_s15 = smov (%p28_p1, %s26_s15), 0  ;;  %p157_p3 = pnand %p1337_p0, %p156_p2 }
   0x6   : > { %p191_p4 = scmp.lt.s32.totalorder (!%p157_p3), %s1423_s12, 1 }
   0x7   : > { %160 = sbr.rel (%p157_p3) target bundleno = 330 (0x14a), region = 28 }
   0xc   : > { %vm540_vm0 = vcmask 1043456   ;;  %v1351_v0 = vld [vmem:[%s1929_s1 + $0x8] sm:$0xf]  ;;  %v397_v1 = vld [vmem:[%s1929_s1] sm:$0xf]  ;;  %s1961_s12 = smov (!%p191_p4, %s1423_s12), 1 }
   0xd   : > { %v672_v2 = vsel %vm540_vm0, %v1351_v0, 0  ;;  %v606_v3 = vsel %vm540_vm0, %v397_v1, 0  ;;  %v1342_v4 = vld [vmem:[%s1929_s1 + $0x4] sm:$0xf]  ;;  %v1356_v6 = vld [vmem:[%s1929_s1 + $0xc] sm:$0xf] }
   0xe   : > { %681 = vmatpush.bf16.msra.mxu2 %v672_v2  ;;  %615 = vmatpush.bf16.msra.mxu1 %v606_v3  ;;  %v542_v5 = vsel %vm540_vm0, %v1342_v4, 0  ;;  %v1371_v7 = vld [vmem:[%s1929_s1 + $0x18] sm:$0xf]  ;;  %v850_v8 = vsel %vm540_vm0, %v1356_v6, 0  ;;  %s1384_s26 = smul.u32 288, %s1961_s12  ;;  %vm527_vm1 = vcmask 64512  }
   0xf   : > { %551 = vmatpush.bf16.msra.mxu0 %v542_v5  ;;  %v1043_v9 = vsel %vm540_vm0, %v1371_v7, 0  ;;  %859 = vmatpush.bf16.msra.mxu3 %v850_v8  ;;  %v1361_v10 = vld [vmem:[%s1929_s1 + $0x10] sm:$0xf]  ;;  %v1376_v11 = vld [vmem:[%s1929_s1 + $0x1c] sm:$0xf]  ;;  %s1383_s9 = sshll.u32 %s1961_s12, 5 }
  0x10   : > { %v1366_v12 = vld [vmem:[%s1929_s1 + $0x14] sm:$0xf]  ;;  %s1506_s8 = scalar_lea.vmem %s1928_s0, %s1384_s26  ;;  %v910_v13 = vsel %vm540_vm0, %v1361_v10, 0  ;;  %v1116_v14 = vsel %vm540_vm0, %v1376_v11, 0  ;;  %vm398_vm4 = vsmask.f32 3328  ;;  %s1879_s16 = scalar_lea.vmem %s1930_s2, %s1383_s9 }
  0x11   : > { %v983_v15 = vsel %vm540_vm0, %v1366_v12, 0  ;;  %v219_v16 = vld [vmem:[%s1506_s8 + $0x10] sm:$0xff]  ;;  %v217_v18 = vld [vmem:[%s1506_s8] sm:$0xff]  ;;  %vm399_vm5 = vsmask.f32 7440  ;;  %s1341_s17 = sshll.u32 %s1961_s12, 1 }
  0x12   : > { %1052 = vmatpush.bf16.msrb.mxu2 %v1043_v9  ;;  %v223_v17 = vld [vmem:[%s1506_s8 + $0x30] sm:$0xff]  ;;  %vm255_vm2 = vcmp.ge.f32.partialorder %v219_v16, 0.0  ;;  %v291_v19 = vmul.f32 0.2, %v219_v16  ;;  %992 = vmatpush.bf16.msrb.mxu1 %v983_v15  ;;  %v221_v21 = vld [vmem:[%s1506_s8 + $0x20] sm:$0xff]  ;;  %vm253_vm6 = vcmp.ge.f32.partialorder %v217_v18, 0.0  ;;  %vm1535_vm12 = vmor %vm398_vm4, %vm399_vm5  ;;  %s212_s20 = scalar_lea.vmem %s1931_s3, %s1341_s17 }
  0x13   : > { %919 = vmatpush.bf16.msrb.mxu0 %v910_v13  ;;  %1125 = vmatpush.bf16.msrb.mxu3 %v1116_v14  ;;  %vm259_vm3 = vcmp.ge.f32.partialorder %v223_v17, 0.0  ;;  %v295_v20 = vmul.f32 0.2, %v223_v17  ;;  %v289_v22 = vmul.f32 0.2, %v217_v18  ;;  %vm257_vm7 = vcmp.ge.f32.partialorder %v221_v21, 0.0 }
  0x14   : > { %v218_v23 = vld [vmem:[%s1506_s8 + $0x8] sm:$0x1]  ;;  %v327_v24 = vsel %vm255_vm2, %v219_v16, %v291_v19  ;;  %v293_v26 = vmul.f32 0.2, %v221_v21  ;;  %v220_v42 = vld [vmem:[%s1506_s8 + $0x18] sm:$0x1] }
  0x15   : > { %v331_v25 = vsel %vm259_vm3, %v223_v17, %v295_v20  ;;  %v222_v27 = vld [vmem:[%s1506_s8 + $0x28] sm:$0x1]  ;;  %v363_v28 = vpack.c.bf16 %v327_v24, %v327_v24  ;;  %v325_v30 = vsel %vm253_vm6, %v217_v18, %v289_v22  ;;  %vm254_vm8 = vcmp.ge.f32.partialorder %v218_v23, 0.0  ;;  %v224_v47 = vld [vmem:[%s1506_s8 + $0x38] sm:$0x1]  ;;  %v227_v7 = vld [vmem:[%s1506_s8 + $0x50] sm:$0xff] }
  0x16   : > { %v1517_v29 = vpack.c.bf16 %v331_v25, %v331_v25  ;;  %v329_v31 = vsel %vm257_vm7, %v221_v21, %v293_v26  ;;  %v361_v32 = vpack.c.bf16 %v325_v30, %v325_v30  ;;  %vm258_vm9 = vcmp.ge.f32.partialorder %v222_v27, 0.0  ;;  %v231_v12 = vld [vmem:[%s1506_s8 + $0x70] sm:$0xff]  ;;  %v225_v20 = vld [vmem:[%s1506_s8 + $0x40] sm:$0xff] }
  0x17   : > { %v290_v33 = vmul.f32 0.2, %v218_v23  ;;  %v647_v34 = vunpack.c.l.b16 %v363_v28  ;;  %v1520_v36 = vpack.c.bf16 %v329_v31, %v329_v31  ;;  %v294_v37 = vmul.f32 0.2, %v222_v27  ;;  %v229_v24 = vld [vmem:[%s1506_s8 + $0x60] sm:$0xff] }
  0x18   : > { %v648_v35 = vunpack.c.l.b16 %v1517_v29  ;;  %v581_v38 = vunpack.c.l.b16 %v361_v32  ;;  %v402_v40 = vshrl.u32 %v361_v32, 16  ;;  %v405_v41 = vshll.u32 %v361_v32, 16 }
  0x19   : > { %v326_v39 = vsel %vm254_vm8, %v218_v23, %v290_v33  ;;  %v582_v44 = vunpack.c.l.b16 %v1520_v36  ;;  %v330_v45 = vsel %vm258_vm9, %v222_v27, %v294_v37  ;;  %v416_v51 = vshrl.u32 %v1520_v36, 16 }
  0x1a   : > { %v655_v43 = vpack.c.b16 %v648_v35, %v647_v34  ;;  %v362_v46 = vpack.c.bf16 %v326_v39, %v326_v39  ;;  %v366_v48 = vpack.c.bf16 %v330_v45, %v330_v45  ;;  %v404_v49 = vrot.slane %v402_v40, 4  ;;  %v230_v39 = vld [vmem:[%s1506_s8 + $0x68] sm:$0x1] }
  0x1b   : > { %v407_v50 = vrot.slane %v405_v41, 5  ;;  %v589_v52 = vpack.c.b16 %v582_v44, %v581_v38  ;;  %v419_v54 = vshll.u32 %v1520_v36, 16  ;;  %vm256_vm10 = vcmp.ge.f32.partialorder %v220_v42, 0.0  ;;  %v226_v38 = vld [vmem:[%s1506_s8 + $0x48] sm:$0x1] }
  0x1c   : > { %1352 = vmatmul.msk.bf16.vlgmr.msra.gmra.mxu2 %vm527_vm1, %v655_v43  ;;  %v411_v53 = vshll.u32 %v362_v46, 16  ;;  %v418_v56 = vrot.slane %v416_v51, 4  ;;  %v425_v57 = vshll.u32 %v366_v48, 16  ;;  %vm260_vm11 = vcmp.ge.f32.partialorder %v224_v47, 0.0 }
  0x1d   : > { %v408_v55 = vor.u32 %v407_v50, %v404_v49  ;;  %1347 = vmatmul.msk.bf16.vlgmr.msra.gmra.mxu1 %vm527_vm1, %v589_v52  ;;  %v421_v60 = vrot.slane %v419_v54, 5  ;;  %v292_v61 = vmul.f32 0.2, %v220_v42  ;;  %v296_v62 = vmul.f32 0.2, %v224_v47 }
  0x1e   : > { %v413_v59 = vrot.slane %v411_v53, 5  ;;  %v427_v0 = vrot.slane %v425_v57, 5  ;;  %v712_v1 = vshrl.u32 %v363_v28, 16  ;;  %v715_v2 = vshll.u32 %v363_v28, 16  ;;  %v228_v49 = vld [vmem:[%s1506_s8 + $0x58] sm:$0x1] }
  0x1f   : > { %v409_v63 = vrot.slane %v408_v55, 4  ;;  %v422_v3 = vor.u32 %v421_v60, %v418_v56  ;;  %v328_v4 = vsel %vm256_vm10, %v220_v42, %v292_v61  ;;  %v332_v5 = vsel %vm260_vm11, %v224_v47, %v296_v62 }
  0x20   : > { %v726_v6 = vshrl.u32 %v1517_v29, 16  ;;  %v364_v9 = vpack.c.bf16 %v328_v4, %v328_v4  ;;  %v368_v10 = vpack.c.bf16 %v332_v5, %v332_v5  ;;  %v714_v11 = vrot.slane %v712_v1, 4 }
  0x21   : > { %v414_v8 = vsel %vm1535_vm12, %v409_v63, %v413_v59  ;;  %v423_v13 = vrot.slane %v422_v3, 4  ;;  %v717_v15 = vrot.slane %v715_v2, 5  ;;  %v729_v18 = vshll.u32 %v1517_v29, 16 }
  0x22   : > { %v515_v14 = vunpack.c.l.b16 %v414_v8  ;;  %v728_v16 = vrot.slane %v726_v6, 4  ;;  %v721_v17 = vshll.u32 %v364_v9, 16  ;;  %v735_v19 = vshll.u32 %v368_v10, 16 }
  0x23   : > { %vm263_vm13 = vcmp.ge.f32.partialorder %v227_v7, 0.0  ;;  %v1549_v21 = vsel %vm1535_vm12, %v423_v13, %v427_v0  ;;  %v718_v22 = vor.u32 %v717_v15, %v714_v11  ;;  %vm267_vm14 = vcmp.ge.f32.partialorder %v231_v12, 0.0  ;;  %v232_v0 = vld [vmem:[%s1506_s8 + $0x78] sm:$0x1] }
  0x24   : > { %v299_v23 = vmul.f32 0.2, %v227_v7  ;;  %v516_v25 = vunpack.c.l.b16 %v1549_v21  ;;  %v723_v26 = vrot.slane %v721_v17, 5  ;;  %v731_v27 = vrot.slane %v729_v18, 5 }
  0x25   : > { %v737_v28 = vrot.slane %v735_v19, 5  ;;  %v719_v30 = vrot.slane %v718_v22, 4  ;;  %v303_v31 = vmul.f32 0.2, %v231_v12  ;;  %vm261_vm15 = vcmp.ge.f32.partialorder %v225_v20, 0.0 }
  0x26   : > { %v335_v32 = vsel %vm263_vm13, %v227_v7, %v299_v23  ;;  %v523_v33 = vpack.c.b16 %v516_v25, %v515_v14  ;;  %v732_v34 = vor.u32 %v731_v27, %v728_v16  ;;  %vm265_vm0 = vcmp.ge.f32.partialorder %v229_v24, 0.0 }
  0x27   : > { %v1555_v37 = vpack.c.bf16 %v335_v32, %v335_v32  ;;  %v724_v40 = vsel %vm1535_vm12, %v719_v30, %v723_v26  ;;  %v339_v41 = vsel %vm267_vm14, %v231_v12, %v303_v31  ;;  %v297_v42 = vmul.f32 0.2, %v225_v20 }
  0x28   : > { %v301_v43 = vmul.f32 0.2, %v229_v24  ;;  %1343 = vmatmul.msk.bf16.vlgmr.msra.gmra.mxu0 %vm527_vm1, %v523_v33  ;;  %v733_v45 = vrot.slane %v732_v34, 4  ;;  %v825_v46 = vunpack.c.l.b16 %v724_v40  ;;  %v1563_v47 = vpack.c.bf16 %v339_v41, %v339_v41 }
  0x29   : > { %v649_v48 = vunpack.c.l.b16 %v1555_v37  ;;  %v333_v50 = vsel %vm261_vm15, %v225_v20, %v297_v42  ;;  %vm262_vm2 = vcmp.ge.f32.partialorder %v226_v38, 0.0  ;;  %vm266_vm3 = vcmp.ge.f32.partialorder %v230_v39, 0.0 }
  0x2a   : > { %v337_v51 = vsel %vm265_vm0, %v229_v24, %v301_v43  ;;  %v1570_v52 = vsel %vm1535_vm12, %v733_v45, %v737_v28  ;;  %v650_v53 = vunpack.c.l.b16 %v1563_v47  ;;  %v1573_v54 = vpack.c.bf16 %v333_v50, %v333_v50  ;;  %v239_v43 = vld [vmem:[%s1506_s8 + $0xb0] sm:$0xff] }
  0x2b   : > { %v1575_v55 = vpack.c.bf16 %v337_v51, %v337_v51  ;;  %v826_v56 = vunpack.c.l.b16 %v1570_v52  ;;  %v298_v57 = vmul.f32 0.2, %v226_v38  ;;  %v302_v59 = vmul.f32 0.2, %v230_v39  ;;  %v233_v51 = vld [vmem:[%s1506_s8 + $0x80] sm:$0xff] }
  0x2c   : > { %vm264_vm4 = vcmp.ge.f32.partialorder %v228_v49, 0.0  ;;  %v656_v60 = vpack.c.b16 %v650_v53, %v649_v48  ;;  %v583_v61 = vunpack.c.l.b16 %v1573_v54  ;;  %v430_v63 = vshrl.u32 %v1573_v54, 16 }
  0x2d   : > { %v584_v62 = vunpack.c.l.b16 %v1575_v55  ;;  %v833_v1 = vpack.c.b16 %v826_v56, %v825_v46  ;;  %v334_v2 = vsel %vm262_vm2, %v226_v38, %v298_v57  ;;  %v338_v3 = vsel %vm266_vm3, %v230_v39, %v302_v59  ;;  %v235_v38 = vld [vmem:[%s1506_s8 + $0x90] sm:$0xff]  ;;  %v237_v57 = vld [vmem:[%s1506_s8 + $0xa0] sm:$0xff] }
  0x2e   : > { %v433_v4 = vshll.u32 %v1573_v54, 16  ;;  %1353 = vmatmul.msk.bf16.gmra.mxu2 %vm527_vm1, %v656_v60  ;;  %v370_v6 = vpack.c.bf16 %v334_v2, %v334_v2  ;;  %v374_v7 = vpack.c.bf16 %v338_v3, %v338_v3  ;;  %v432_v8 = vrot.slane %v430_v63, 4  ;;  %v234_v3 = vld [vmem:[%s1506_s8 + $0x88] sm:$0x1] }
  0x2f   : > { %v590_v5 = vpack.c.b16 %v584_v62, %v583_v61  ;;  %1357 = vmatmul.msk.bf16.vlgmr.msra.gmra.mxu3 %vm527_vm1, %v833_v1  ;;  %v444_v10 = vshrl.u32 %v1575_v55, 16  ;;  %v447_v11 = vshll.u32 %v1575_v55, 16  ;;  %vm268_vm5 = vcmp.ge.f32.partialorder %v232_v0, 0.0  ;;  %v250_v54 = vld [vmem:[%s1506_s8 + $0x108] sm:$0x1] }
  0x30   : > { %v435_v9 = vrot.slane %v433_v4, 5  ;;  %v439_v12 = vshll.u32 %v370_v6, 16  ;;  %v453_v13 = vshll.u32 %v374_v7, 16  ;;  %v300_v14 = vmul.f32 0.2, %v228_v49 }
  0x31   : > { %1348 = vmatmul.msk.bf16.gmra.mxu1 %vm527_vm1, %v590_v5  ;;  %v304_v15 = vmul.f32 0.2, %v232_v0  ;;  %v446_v17 = vrot.slane %v444_v10, 4  ;;  %v449_v18 = vrot.slane %v447_v11, 5  ;;  %v740_v19 = vshrl.u32 %v1555_v37, 16 }
  0x32   : > { %v436_v16 = vor.u32 %v435_v9, %v432_v8  ;;  %v441_v20 = vrot.slane %v439_v12, 5  ;;  %v455_v22 = vrot.slane %v453_v13, 5  ;;  %v336_v23 = vsel %vm264_vm4, %v228_v49, %v300_v14 }
  0x33   : > { %v340_v24 = vsel %vm268_vm5, %v232_v0, %v304_v15  ;;  %v450_v27 = vor.u32 %v449_v18, %v446_v17  ;;  %v372_v28 = vpack.c.bf16 %v336_v23, %v336_v23  ;;  %v742_v31 = vrot.slane %v740_v19, 4  ;;  %v238_v17 = vld [vmem:[%s1506_s8 + $0xa8] sm:$0x1] }
  0x34   : > { %v437_v26 = vrot.slane %v436_v16, 4  ;;  %v376_v30 = vpack.c.bf16 %v340_v24, %v340_v24  ;;  %v743_v32 = vshll.u32 %v1555_v37, 16  ;;  %v754_v33 = vshrl.u32 %v1563_v47, 16 }
  0x35   : > { %v757_v34 = vshll.u32 %v1563_v47, 16  ;;  %v451_v40 = vrot.slane %v450_v27, 4  ;;  %v749_v41 = vshll.u32 %v372_v28, 16  ;;  %vm271_vm6 = vcmp.ge.f32.partialorder %v235_v38, 0.0 }
  0x36   : > { %v1608_v39 = vsel %vm1535_vm12, %v437_v26, %v441_v20  ;;  %v763_v42 = vshll.u32 %v376_v30, 16  ;;  %v745_v46 = vrot.slane %v743_v32, 5  ;;  %v756_v49 = vrot.slane %v754_v33, 4 }
  0x37   : > { %v517_v45 = vunpack.c.l.b16 %v1608_v39  ;;  %v759_v50 = vrot.slane %v757_v34, 5  ;;  %v1616_v59 = vsel %vm1535_vm12, %v451_v40, %v455_v22  ;;  %v751_v60 = vrot.slane %v749_v41, 5  ;;  %v236_v40 = vld [vmem:[%s1506_s8 + $0x98] sm:$0x1] }
  0x38   : > { %v765_v63 = vrot.slane %v763_v42, 5  ;;  %v518_v0 = vunpack.c.l.b16 %v1616_v59  ;;  %v746_v1 = vor.u32 %v745_v46, %v742_v31  ;;  %vm275_vm7 = vcmp.ge.f32.partialorder %v239_v43, 0.0 }
  0x39   : > { %v760_v2 = vor.u32 %v759_v50, %v756_v49  ;;  %v307_v4 = vmul.f32 0.2, %v235_v38  ;;  %v311_v5 = vmul.f32 0.2, %v239_v43  ;;  %vm269_vm8 = vcmp.ge.f32.partialorder %v233_v51, 0.0 }
  0x3a   : > { %vm273_vm9 = vcmp.ge.f32.partialorder %v237_v57, 0.0  ;;  %v524_v6 = vpack.c.b16 %v518_v0, %v517_v45  ;;  %v747_v7 = vrot.slane %v746_v1, 4  ;;  %v305_v9 = vmul.f32 0.2, %v233_v51  ;;  %v240_v49 = vld [vmem:[%s1506_s8 + $0xb8] sm:$0x1] }
  0x3b   : > { %v761_v8 = vrot.slane %v760_v2, 4  ;;  %v343_v10 = vsel %vm271_vm6, %v235_v38, %v307_v4  ;;  %v347_v11 = vsel %vm275_vm7, %v239_v43, %v311_v5  ;;  %v309_v12 = vmul.f32 0.2, %v237_v57 }
  0x3c   : > { %vm270_vm10 = vcmp.ge.f32.partialorder %v234_v3, 0.0  ;;  %1344 = vmatmul.msk.bf16.gmra.mxu0 %vm527_vm1, %v524_v6  ;;  %v1627_v13 = vsel %vm1535_vm12, %v747_v7, %v751_v60  ;;  %v1633_v15 = vpack.c.bf16 %v343_v10, %v343_v10  ;;  %v1635_v16 = vpack.c.bf16 %v347_v11, %v347_v11 }
  0x3d   : > { %v1631_v14 = vsel %vm1535_vm12, %v761_v8, %v765_v63  ;;  %v1942_v18 = vunpack.c.l.b16 %v1627_v13  ;;  %v341_v20 = vsel %vm269_vm8, %v233_v51, %v305_v9  ;;  %v345_v22 = vsel %vm273_vm9, %v237_v57, %v309_v12 }
  0x3e   : > { %v1936_v19 = vunpack.c.l.b16 %v1631_v14  ;;  %v651_v23 = vunpack.c.l.b16 %v1633_v15  ;;  %v1941_v24 = vunpack.c.l.b16 %v1635_v16  ;;  %v1644_v26 = vpack.c.bf16 %v341_v20, %v341_v20 }
  0x3f   : > { %v1646_v27 = vpack.c.bf16 %v345_v22, %v345_v22  ;;  %vm274_vm11 = vcmp.ge.f32.partialorder %v238_v17, 0.0  ;;  %v306_v30 = vmul.f32 0.2, %v234_v3  ;;  %v310_v31 = vmul.f32 0.2, %v238_v17 }
  0x40   : > { %v834_v28 = vpack.c.b16 %v1936_v19, %v1942_v18  ;;  %v657_v32 = vpack.c.b16 %v1941_v24, %v651_v23  ;;  %v585_v33 = vunpack.c.l.b16 %v1644_v26  ;;  %v458_v38 = vshrl.u32 %v1644_v26, 16 }
  0x41   : > { %v1934_v34 = vunpack.c.l.b16 %v1646_v27  ;;  %v342_v41 = vsel %vm270_vm10, %v234_v3, %v306_v30  ;;  %v346_v42 = vsel %vm274_vm11, %v238_v17, %v310_v31  ;;  %v461_v43 = vshll.u32 %v1644_v26, 16 }
  0x42   : > { %1358 = vmatmul.msk.bf16.gmra.mxu3 %vm527_vm1, %v834_v28  ;;  %v472_v46 = vshrl.u32 %v1646_v27, 16  ;;  %1354 = vmatmul.msk.bf16.gmra.mxu2 %vm527_vm1, %v657_v32  ;;  %v378_v51 = vpack.c.bf16 %v342_v41, %v342_v41  ;;  %v382_v57 = vpack.c.bf16 %v346_v42, %v346_v42  ;;  %v460_v60 = vrot.slane %v458_v38, 4  ;;  %v243_v42 = vld [vmem:[%s1506_s8 + $0xd0] sm:$0xff] }
  0x43   : > { %v591_v50 = vpack.c.b16 %v1934_v34, %v585_v33  ;;  %v463_v63 = vrot.slane %v461_v43, 5  ;;  %v475_v2 = vshll.u32 %v1646_v27, 16  ;;  %vm272_vm13 = vcmp.ge.f32.partialorder %v236_v40, 0.0 }
  0x44   : > { %v474_v1 = vrot.slane %v472_v46, 4  ;;  %v467_v3 = vshll.u32 %v378_v51, 16  ;;  %v481_v4 = vshll.u32 %v382_v57, 16  ;;  %vm276_vm14 = vcmp.ge.f32.partialorder %v240_v49, 0.0  ;;  %v247_v51 = vld [vmem:[%s1506_s8 + $0xf0] sm:$0xff] }
  0x45   : > { %1349 = vmatmul.msk.bf16.gmra.mxu1 %vm527_vm1, %v591_v50  ;;  %v308_v5 = vmul.f32 0.2, %v236_v40  ;;  %v464_v6 = vor.u32 %v463_v63, %v460_v60  ;;  %v477_v7 = vrot.slane %v475_v2, 5  ;;  %v312_v8 = vmul.f32 0.2, %v240_v49 }
  0x46   : > { %v768_v9 = vshrl.u32 %v1633_v15, 16  ;;  %v469_v10 = vrot.slane %v467_v3, 5  ;;  %v483_v11 = vrot.slane %v481_v4, 5  ;;  %v771_v17 = vshll.u32 %v1633_v15, 16 }
  0x47   : > { %v344_v12 = vsel %vm272_vm13, %v236_v40, %v308_v5  ;;  %v465_v20 = vrot.slane %v464_v6, 4  ;;  %v478_v22 = vor.u32 %v477_v7, %v474_v1  ;;  %v348_v28 = vsel %vm276_vm14, %v240_v49, %v312_v8  ;;  %v241_v1 = vld [vmem:[%s1506_s8 + $0xc0] sm:$0xff] }
  0x48   : > { %v380_v30 = vpack.c.bf16 %v344_v12, %v344_v12  ;;  %v384_v31 = vpack.c.bf16 %v348_v28, %v348_v28  ;;  %v770_v32 = vrot.slane %v768_v9, 4  ;;  %v773_v38 = vrot.slane %v771_v17, 5  ;;  %v245_v5 = vld [vmem:[%s1506_s8 + $0xe0] sm:$0xff]  ;;  %v242_v9 = vld [vmem:[%s1506_s8 + $0xc8] sm:$0x1] }
  0x49   : > { %v782_v41 = vshrl.u32 %v1635_v16, 16  ;;  %v1678_v43 = vsel %vm1535_vm12, %v465_v20, %v469_v10  ;;  %v479_v46 = vrot.slane %v478_v22, 4  ;;  %v785_v50 = vshll.u32 %v1635_v16, 16  ;;  %v246_v28 = vld [vmem:[%s1506_s8 + $0xe8] sm:$0x1] }
  0x4a   : > { %v777_v40 = vshll.u32 %v380_v30, 16  ;;  %v519_v49 = vunpack.c.l.b16 %v1678_v43  ;;  %v774_v57 = vor.u32 %v773_v38, %v770_v32  ;;  %v791_v63 = vshll.u32 %v384_v31, 16 }
  0x4b   : > { %v784_v60 = vrot.slane %v782_v41, 4  ;;  %v1686_v2 = vsel %vm1535_vm12, %v479_v46, %v483_v11  ;;  %v787_v4 = vrot.slane %v785_v50, 5  ;;  %vm279_vm15 = vcmp.ge.f32.partialorder %v243_v42, 0.0 }
  0x4c   : > { %v779_v3 = vrot.slane %v777_v40, 5  ;;  %v1939_v6 = vunpack.c.l.b16 %v1686_v2  ;;  %v775_v7 = vrot.slane %v774_v57, 4  ;;  %v793_v8 = vrot.slane %v791_v63, 5 }
  0x4d   : > { %vm283_vm0 = vcmp.ge.f32.partialorder %v247_v51, 0.0  ;;  %v788_v10 = vor.u32 %v787_v4, %v784_v60  ;;  %v315_v12 = vmul.f32 0.2, %v243_v42  ;;  %v319_v17 = vmul.f32 0.2, %v247_v51 }
  0x4e   : > { %vm277_vm2 = vcmp.ge.f32.partialorder %v241_v1, 0.0  ;;  %v525_v11 = vpack.c.b16 %v1939_v6, %v519_v49  ;;  %v1697_v20 = vsel %vm1535_vm12, %v775_v7, %v779_v3  ;;  %vm281_vm3 = vcmp.ge.f32.partialorder %v245_v5, 0.0 }
  0x4f   : > { %v313_v22 = vmul.f32 0.2, %v241_v1  ;;  %v789_v30 = vrot.slane %v788_v10, 4  ;;  %v1935_v31 = vunpack.c.l.b16 %v1697_v20  ;;  %v351_v32 = vsel %vm279_vm15, %v243_v42, %v315_v12 }
  0x50   : > { %v355_v38 = vsel %vm283_vm0, %v247_v51, %v319_v17  ;;  %1345 = vmatmul.msk.bf16.gmra.mxu0 %vm527_vm1, %v525_v11  ;;  %v1703_v41 = vpack.c.bf16 %v351_v32, %v351_v32  ;;  %v317_v40 = vmul.f32 0.2, %v245_v5  ;;  %vm278_vm4 = vcmp.ge.f32.partialorder %v242_v9, 0.0  ;;  %v244_v11 = vld [vmem:[%s1506_s8 + $0xd8] sm:$0x1] }
  0x51   : > { %v1705_v46 = vpack.c.bf16 %v355_v38, %v355_v38  ;;  %v349_v50 = vsel %vm277_vm2, %v241_v1, %v313_v22  ;;  %v1709_v57 = vsel %vm1535_vm12, %v789_v30, %v793_v8  ;;  %vm282_vm5 = vcmp.ge.f32.partialorder %v246_v28, 0.0 }
  0x52   : > { %v1711_v60 = vpack.c.bf16 %v349_v50, %v349_v50  ;;  %v1932_v42 = vunpack.c.l.b16 %v1709_v57  ;;  %v1940_v51 = vunpack.c.l.b16 %v1703_v41  ;;  %v353_v3 = vsel %vm281_vm3, %v245_v5, %v317_v40  ;;  %v248_v40 = vld [vmem:[%s1506_s8 + $0xf8] sm:$0x1] }
  0x53   : > { %v1933_v63 = vunpack.c.l.b16 %v1705_v46  ;;  %v1717_v4 = vpack.c.bf16 %v353_v3, %v353_v3  ;;  %v314_v7 = vmul.f32 0.2, %v242_v9  ;;  %v318_v8 = vmul.f32 0.2, %v246_v28 }
  0x54   : > { %v1938_v1 = vunpack.c.l.b16 %v1711_v60  ;;  %v835_v10 = vpack.c.b16 %v1932_v42, %v1935_v31  ;;  %v486_v17 = vshrl.u32 %v1711_v60, 16  ;;  %v489_v5 = vshll.u32 %v1711_v60, 16 }
  0x55   : > { %v658_v12 = vpack.c.b16 %v1933_v63, %v1940_v51  ;;  %v1937_v22 = vunpack.c.l.b16 %v1717_v4  ;;  %v350_v30 = vsel %vm278_vm4, %v242_v9, %v314_v7  ;;  %v354_v32 = vsel %vm282_vm5, %v246_v28, %v318_v8 }
  0x56   : > { %v500_v38 = vshrl.u32 %v1717_v4, 16  ;;  %1359 = vmatmul.msk.bf16.gmra.mxu3 %vm527_vm1, %v835_v10  ;;  %v386_v50 = vpack.c.bf16 %v350_v30, %v350_v30  ;;  %v390_v3 = vpack.c.bf16 %v354_v32, %v354_v32  ;;  %v488_v42 = vrot.slane %v486_v17, 4 }
  0x57   : > { %1355 = vmatmul.msk.bf16.gmra.mxu2 %vm527_vm1, %v658_v12  ;;  %v491_v63 = vrot.slane %v489_v5, 5  ;;  %v592_v34 = vpack.c.b16 %v1937_v22, %v1938_v1  ;;  %v503_v9 = vshll.u32 %v1717_v4, 16  ;;  %vm280_vm6 = vcmp.ge.f32.partialorder %v244_v11, 0.0 }
  0x58   : > { %v502_v31 = vrot.slane %v500_v38, 4  ;;  %v495_v7 = vshll.u32 %v386_v50, 16  ;;  %v509_v8 = vshll.u32 %v390_v3, 16  ;;  %vm284_vm7 = vcmp.ge.f32.partialorder %v248_v40, 0.0 }
  0x59   : > { %v492_v28 = vor.u32 %v491_v63, %v488_v42  ;;  %1350 = vmatmul.msk.bf16.gmra.mxu1 %vm527_vm1, %v592_v34  ;;  %v505_v10 = vrot.slane %v503_v9, 5  ;;  %v316_v12 = vmul.f32 0.2, %v244_v11  ;;  %v320_v30 = vmul.f32 0.2, %v248_v40 }
  0x5a   : > { %v796_v17 = vshrl.u32 %v1703_v41, 16  ;;  %v497_v32 = vrot.slane %v495_v7, 5  ;;  %v511_v19 = vrot.slane %v509_v8, 5  ;;  %v799_v22 = vshll.u32 %v1703_v41, 16 }
  0x5b   : > { %v493_v5 = vrot.slane %v492_v28, 4  ;;  %v506_v38 = vor.u32 %v505_v10, %v502_v31  ;;  %v352_v1 = vsel %vm280_vm6, %v244_v11, %v316_v12  ;;  %v356_v6 = vsel %vm284_vm7, %v248_v40, %v320_v30 }
  0x5c   : > { %v798_v51 = vrot.slane %v796_v17, 4  ;;  %v388_v63 = vpack.c.bf16 %v352_v1, %v352_v1  ;;  %v392_v50 = vpack.c.bf16 %v356_v6, %v356_v6  ;;  %v801_v34 = vrot.slane %v799_v22, 5 }
  0x5d   : > { %v498_v42 = vsel %vm1535_vm12, %v493_v5, %v497_v32  ;;  %v507_v3 = vrot.slane %v506_v38, 4  ;;  %v810_v9 = vshrl.u32 %v1705_v46, 16  ;;  %v813_v24 = vshll.u32 %v1705_v46, 16 }
  0x5e   : > { %v521_v28 = vunpack.c.l.b16 %v498_v42  ;;  %v802_v7 = vor.u32 %v801_v34, %v798_v51  ;;  %v805_v8 = vshll.u32 %v388_v63, 16  ;;  %v819_v18 = vshll.u32 %v392_v50, 16  ;;  %v252_v50 = vld [vmem:[%s1506_s8 + $0x118] sm:$0x1] }
  0x5f   : > { %v1752_v31 = vsel %vm1535_vm12, %v507_v3, %v511_v19  ;;  %v812_v11 = vrot.slane %v810_v9, 4  ;;  %v815_v40 = vrot.slane %v813_v24, 5  ;;  %v1026_v19 = vpack.c.b16 %v649_v48, %v648_v35  ;;  %v249_v48 = vld [vmem:[%s1506_s8 + $0x100] sm:$0xff] }
  0x60   : > { %v522_v10 = vunpack.c.l.b16 %v1752_v31  ;;  %v803_v1 = vrot.slane %v802_v7, 4  ;;  %v807_v6 = vrot.slane %v805_v8, 5  ;;  %v821_v12 = vrot.slane %v819_v18, 5 }
  0x61   : > { %v816_v22 = vor.u32 %v815_v40, %v812_v11  ;;  %v894_v24 = vpack.c.b16 %v585_v33, %v584_v62  ;;  %v966_v29 = vpack.c.b16 %v517_v45, %v516_v25  ;;  %v893_v21 = vpack.c.b16 %v583_v61, %v582_v44 }
  0x62   : > { %v526_v30 = vpack.c.b16 %v522_v10, %v521_v28  ;;  %v1759_v51 = vsel %vm1535_vm12, %v803_v1, %v807_v6  ;;  %v1027_v25 = vpack.c.b16 %v651_v23, %v650_v53  ;;  %v321_v55 = vmul.f32 0.2, %v249_v48 }
  0x63   : > { %v817_v17 = vrot.slane %v816_v22, 4  ;;  %v831_v18 = vunpack.c.l.b16 %v1759_v51  ;;  %vm285_vm8 = vcmp.ge.f32.partialorder %v249_v48, 0.0  ;;  %v967_v62 = vpack.c.b16 %v519_v49, %v518_v0  ;;  %v251_v0 = vld [vmem:[%s1506_s8 + $0x110] sm:$0xff] }
  0x64   : > { %1346 = vmatmul.msk.bf16.gmra.mxu0 %vm527_vm1, %v526_v30  ;;  %v1945_v36 = vunpack.c.l.b16 %v1627_v13  ;;  %v357_v47 = vsel %vm285_vm8, %v249_v48, %v321_v55  ;;  %v322_v61 = vmul.f32 0.2, %v250_v54  ;;  %vm286_vm9 = vcmp.ge.f32.partialorder %v250_v54, 0.0 }
  0x65   : > { %v1773_v5 = vsel %vm1535_vm12, %v817_v17, %v821_v12  ;;  %v393_v53 = vpack.c.bf16 %v357_v47, %v357_v47  ;;  %v1946_v52 = vunpack.c.l.b16 %v1635_v16  ;;  %v323_v33 = vmul.f32 0.2, %v251_v0 }
  0x66   : > { %v832_v35 = vunpack.c.l.b16 %v1773_v5  ;;  %v1099_v44 = vpack.c.b16 %v1945_v36, %v826_v56  ;;  %v358_v59 = vsel %vm286_vm9, %v250_v54, %v322_v61  ;;  %v1947_v56 = vunpack.c.l.b16 %v1703_v41 }
  0x67   : > { %1372 = vmatmul.msk.bf16.vlgmr.msrb.gmra.mxu2 %vm527_vm1, %v1026_v19  ;;  %v950_v39 = vshrl.u32 %v393_v53, 16  ;;  %v953_v45 = vshll.u32 %v393_v53, 16  ;;  %v394_v15 = vpack.c.bf16 %v358_v59, %v358_v59  ;;  %vm287_vm10 = vcmp.ge.f32.partialorder %v251_v0, 0.0 }
  0x68   : > { %v836_v37 = vpack.c.b16 %v832_v35, %v831_v18  ;;  %v1028_v13 = vpack.c.b16 %v1947_v56, %v1946_v52  ;;  %v1948_v43 = vunpack.c.l.b16 %v1686_v2  ;;  %v1949_v32 = vunpack.c.l.b16 %v1631_v14 }
  0x69   : > { %1367 = vmatmul.msk.bf16.vlgmr.msrb.gmra.mxu1 %vm527_vm1, %v966_v29  ;;  %v952_v23 = vrot.slane %v950_v39, 4  ;;  %v955_v26 = vrot.slane %v953_v45, 5  ;;  %v1950_v38 = vunpack.c.l.b16 %v1697_v20  ;;  %v959_v41 = vshll.u32 %v394_v15, 16 }
  0x6a   : > { %1360 = vmatmul.msk.bf16.gmra.mxu3 %vm527_vm1, %v836_v37  ;;  %v968_v49 = vpack.c.b16 %v521_v28, %v1948_v43  ;;  %v359_v63 = vsel %vm287_vm10, %v251_v0, %v323_v33  ;;  %v324_v2 = vmul.f32 0.2, %v252_v50  ;;  %vm288_vm11 = vcmp.ge.f32.partialorder %v252_v50, 0.0 }
  0x6b   : > { %v1100_v42 = vpack.c.b16 %v1950_v38, %v1949_v32  ;;  %v956_v16 = vor.u32 %v955_v26, %v952_v23  ;;  %v395_v34 = vpack.c.bf16 %v359_v63, %v359_v63  ;;  %v961_v9 = vrot.slane %v959_v41, 5 }
  0x6c   : > { %v1951_v8 = vunpack.c.l.b16 %v1646_v27  ;;  %v1952_v11 = vunpack.c.l.b16 %v1711_v60  ;;  %v360_v1 = vsel %vm288_vm11, %v252_v50, %v324_v2  ;;  %v1953_v22 = vunpack.c.l.b16 %v1705_v46 }
  0x6d   : > { %v957_v3 = vrot.slane %v956_v16, 4  ;;  %v1025_v28 = vunpack.c.l.b16 %v395_v34  ;;  %v1083_v20 = vshrl.u32 %v395_v34, 16  ;;  %v1086_v7 = vshll.u32 %v395_v34, 16 }
  0x6e   : > { %v895_v40 = vpack.c.b16 %v1952_v11, %v1951_v8  ;;  %v396_v30 = vpack.c.bf16 %v360_v1, %v360_v1  ;;  %v1954_v17 = vunpack.c.l.b16 %v1709_v57  ;;  %v892_v48 = vunpack.c.l.b16 %v393_v53 }
  0x6f   : > { %v962_v14 = vsel %vm1535_vm12, %v957_v3, %v961_v9  ;;  %v1029_v12 = vpack.c.b16 %v1025_v28, %v1953_v22  ;;  %v1085_v51 = vrot.slane %v1083_v20, 4  ;;  %v1088_v19 = vrot.slane %v1086_v7, 5 }
  0x70   : > { %v965_v6 = vunpack.c.l.b16 %v962_v14  ;;  %v1101_v29 = vpack.c.b16 %v831_v18, %v1954_v17  ;;  %v1092_v60 = vshll.u32 %v396_v30, 16 }
  0x71   : > { %v1089_v27 = vor.u32 %v1088_v19, %v1085_v51 }
  0x73   : > { %v1090_v37 = vrot.slane %v1089_v27, 4 }
  0x74   : > { %1362 = vmatmul.msk.bf16.vlgmr.msrb.gmra.mxu0 %vm527_vm1, %v893_v21  ;;  %v1094_v21 = vrot.slane %v1092_v60, 5 }
  0x76   : > { %v1095_v31 = vsel %vm1535_vm12, %v1090_v37, %v1094_v21  ;;  %vm1189_vm12 = vcmask 1040384  }
  0x77   : > { %1373 = vmatmul.msk.bf16.gmra.mxu2 %vm527_vm1, %v1027_v25  ;;  %v1098_v18 = vunpack.c.l.b16 %v1095_v31 }
  0x79   : > { %1368 = vmatmul.msk.bf16.gmra.mxu1 %vm527_vm1, %v967_v62  ;;  %v1102_v36 = vpack.c.b16 %v1098_v18, %v832_v35 }
  0x7a   : > { %1377 = vmatmul.msk.bf16.vlgmr.msrb.gmra.mxu3 %vm527_vm1, %v1099_v44 }
  0x84   : > { %1363 = vmatmul.msk.bf16.gmra.mxu0 %vm527_vm1, %v894_v24  ;;  %v969_v24 = vpack.c.b16 %v965_v6, %v522_v10  ;;  %v1955_v10 = vunpack.c.l.b16 %v1717_v4 }
  0x86   : > { %v896_v57 = vpack.c.b16 %v892_v48, %v1955_v10 }
  0x87   : > { %1374 = vmatmul.msk.bf16.gmra.mxu2 %vm527_vm1, %v1028_v13 }
  0x89   : > { %1369 = vmatmul.msk.bf16.gmra.mxu1 %vm527_vm1, %v968_v49 }
  0x8a   : > { %1378 = vmatmul.msk.bf16.gmra.mxu3 %vm527_vm1, %v1100_v42 }
  0x94   : > { %1364 = vmatmul.msk.bf16.gmra.mxu0 %vm527_vm1, %v895_v40 }
  0x97   : > { %1375 = vmatmul.msk.bf16.gmra.mxu2 %vm527_vm1, %v1029_v12 }
  0x99   : > { %1370 = vmatmul.msk.bf16.gmra.mxu1 %vm527_vm1, %v969_v24 }
  0x9a   : > { %1379 = vmatmul.msk.bf16.gmra.mxu3 %vm527_vm1, %v1101_v29  ;;  %v617_v46 = vpop.f32.mrf.mxu1 }
  0x9f   : > { %v683_v25 = vpop.f32.mrf.mxu2 }
  0xa2   : > { %v619_v55 = vpop.f32.mrf.mxu1 }
  0xa4   : > { %1365 = vmatmul.msk.bf16.gmra.mxu0 %vm527_vm1, %v896_v57 }
  0xa5   : > { %v553_v62 = vpop.f32.mrf.mxu0 }
  0xa6   : > { %v618_v63 = vadd.f32 %v617_v46, %v553_v62 }
  0xa7   : > { %v685_v44 = vpop.f32.mrf.mxu2 }
  0xa8   : > { %v703_v3 = vadd.f32 %v683_v25, %v618_v63 }
  0xaa   : > { %1380 = vmatmul.msk.bf16.gmra.mxu3 %vm527_vm1, %v1102_v36  ;;  %vm1200_vm1 = vcmask 60416  }
  0xad   : > { %v555_v54 = vpop.f32.mrf.mxu0 }
  0xae   : > { %v622_v47 = vpop.f32.mrf.mxu1  ;;  %v620_v14 = vadd.f32 %v619_v55, %v555_v54 }
  0xb0   : > { %v704_v11 = vadd.f32 %v685_v44, %v620_v14 }
  0xb1   : > { %v688_v53 = vpop.f32.mrf.mxu2 }
  0xb2   : > { %v861_v61 = vpop.f32.mrf.mxu3 }
  0xb3   : > { %v881_v9 = vadd.f32 %v861_v61, %v703_v3 }
  0xb6   : > { %v624_v58 = vpop.f32.mrf.mxu1 }
  0xb9   : > { %v558_v39 = vpop.f32.mrf.mxu0  ;;  %v690_v4 = vpop.f32.mrf.mxu2 }
  0xba   : > { %v863_v45 = vpop.f32.mrf.mxu3  ;;  %v623_v22 = vadd.f32 %v622_v47, %v558_v39 }
  0xbb   : > { %v882_v1 = vadd.f32 %v863_v45, %v704_v11 }
  0xbc   : > { %v705_v24 = vadd.f32 %v688_v53, %v623_v22 }
  0xc1   : > { %v560_v0 = vpop.f32.mrf.mxu0 }
  0xc2   : > { %v627_v59 = vpop.f32.mrf.mxu1  ;;  %v625_v21 = vadd.f32 %v624_v58, %v560_v0 }
  0xc4   : > { %v706_v57 = vadd.f32 %v690_v4, %v625_v21 }
  0xc5   : > { %v866_v52 = vpop.f32.mrf.mxu3  ;;  %v1847_v56 = vpop.f32.mrf.mxu2 }
  0xc6   : > { %v883_v60 = vadd.f32 %v866_v52, %v705_v24 }
  0xca   : > { %v1849_v13 = vpop.f32.mrf.mxu1 }
  0xcd   : > { %v563_v5 = vpop.f32.mrf.mxu0  ;;  %v868_v35 = vpop.f32.mrf.mxu3 }
  0xce   : > { %v1851_v15 = vpop.f32.mrf.mxu2  ;;  %v884_v62 = vadd.f32 %v868_v35, %v706_v57  ;;  %v628_v54 = vadd.f32 %v627_v59, %v563_v5 }
  0xd0   : > { %v707_v39 = vadd.f32 %v1847_v56, %v628_v54 }
  0xd5   : > { %v1855_v26 = vpop.f32.mrf.mxu0 }
  0xd6   : > { %v1853_v23 = vpop.f32.mrf.mxu1  ;;  %v630_v35 = vadd.f32 %v1849_v13, %v1855_v26 }
  0xd9   : > { %v871_v33 = vpop.f32.mrf.mxu3 }
  0xda   : > { %v1857_v43 = vpop.f32.mrf.mxu2 }
  0xde   : > { %v1859_v49 = vpop.f32.mrf.mxu1 }
  0xe1   : > { %v1861_v32 = vpop.f32.mrf.mxu0  ;;  %v1865_v42 = vpop.f32.mrf.mxu3 }
  0xe2   : > { %v1863_v38 = vpop.f32.mrf.mxu2 }
  0xe6   : > { %v994_v16 = vpop.f32.mrf.mxu1 }
  0xe9   : > { %v1867_v41 = vpop.f32.mrf.mxu0 }
  0xea   : > { %v1054_v50 = vpop.f32.mrf.mxu2 }
  0xed   : > { %v1869_v34 = vpop.f32.mrf.mxu3 }
  0xee   : > { %v996_v28 = vpop.f32.mrf.mxu1 }
  0xf1   : > { %v921_v2 = vpop.f32.mrf.mxu0 }
  0xf2   : > { %v941_v20 = vadd.f32 %v921_v2, %v881_v9  ;;  %v1056_v8 = vpop.f32.mrf.mxu2  ;;  %v708_v9 = vadd.f32 %v1851_v15, %v630_v35 }
  0xf4   : > { %v1014_v40 = vadd.f32 %v994_v16, %v941_v20  ;;  %v885_v16 = vadd.f32 %v871_v33, %v707_v39 }
  0xf5   : > { %v1871_v7 = vpop.f32.mrf.mxu3 }
  0xf6   : > { %v1074_v12 = vadd.f32 %v1054_v50, %v1014_v40  ;;  %v999_v51 = vpop.f32.mrf.mxu1 }
  0xf9   : > { %v923_v6 = vpop.f32.mrf.mxu0 }
  0xfa   : > { %v942_v30 = vadd.f32 %v923_v6, %v882_v1  ;;  %v1059_v27 = vpop.f32.mrf.mxu2 }
  0xfc   : > { %v1015_v29 = vadd.f32 %v996_v28, %v942_v30  ;;  %v886_v28 = vadd.f32 %v1865_v42, %v708_v9  ;;  %v635_v30 = vadd.f32 %v1859_v49, %v1867_v41 }
  0xfd   : > { %v1127_v19 = vpop.f32.mrf.mxu3 }
  0xfe   : > { %v1874_v17 = vadd.f32 %v1127_v19, %v1074_v12  ;;  %v1075_v48 = vadd.f32 %v1056_v8, %v1015_v29  ;;  %v1001_v10 = vpop.f32.mrf.mxu1  ;;  %v633_v8 = vadd.f32 %v1853_v23, %v1861_v32  ;;  %v710_v24 = vadd.f32 %v1863_v38, %v635_v30 }
 0x100   : > { %v1192_v46 = vpack.c.bf16 %v1874_v17, %v1874_v17  ;;  %v709_v1 = vadd.f32 %v1857_v43, %v633_v8  ;;  %v1168_v41 = vmul.f32 %v1874_v17, %v1874_v17 }
 0x101   : > { %v926_v37 = vpop.f32.mrf.mxu0 }
 0x102   : > { %1201 = vst.msk [vmem:[%s1879_s16] sm:$0xf] %vm1200_vm1, %v1192_v46  ;;  %v943_v25 = vadd.f32 %v926_v37, %v883_v60  ;;  %v1061_v44 = vpop.f32.mrf.mxu2  ;;  %v887_v22 = vadd.f32 %v1869_v34, %v709_v1  ;;  %v888_v60 = vadd.f32 %v1871_v7, %v710_v24 }
 0x104   : > { %v1016_v55 = vadd.f32 %v999_v51, %v943_v25 }
 0x105   : > { %v1129_v31 = vpop.f32.mrf.mxu3 }
 0x106   : > { %v1148_v18 = vadd.f32 %v1129_v31, %v1075_v48  ;;  %v1076_v53 = vadd.f32 %v1059_v27, %v1016_v55  ;;  %v1004_v52 = vpop.f32.mrf.mxu1 }
 0x108   : > { %v1193_v36 = vpack.c.bf16 %v1148_v18, %v1148_v18  ;;  %v1169_v46 = vmul.f32 %v1148_v18, %v1148_v18  ;;  %v1155_v48 = vadd.f32 %v1148_v18, %v1874_v17 }
 0x109   : > { %v928_v47 = vpop.f32.mrf.mxu0 }
 0x10a   : > { %1202 = vst.msk [vmem:[%s1879_s16 + $0x4] sm:$0xf] %vm1200_vm1, %v1193_v36  ;;  %v944_v61 = vadd.f32 %v928_v47, %v884_v62  ;;  %v1064_v50 = vpop.f32.mrf.mxu2  ;;  %v1176_v38 = vadd.f32 %v1169_v46, %v1168_v41 }
 0x10c   : > { %v1017_v0 = vadd.f32 %v1001_v10, %v944_v61 }
 0x10d   : > { %v1132_v58 = vpop.f32.mrf.mxu3 }
 0x10e   : > { %v1149_v45 = vadd.f32 %v1132_v58, %v1076_v53  ;;  %v1077_v59 = vadd.f32 %v1061_v44, %v1017_v0  ;;  %v1006_v33 = vpop.f32.mrf.mxu1 }
 0x110   : > { %v1194_v4 = vpack.c.bf16 %v1149_v45, %v1149_v45  ;;  %v1170_v25 = vmul.f32 %v1149_v45, %v1149_v45  ;;  %v1156_v57 = vadd.f32 %v1155_v48, %v1149_v45 }
 0x111   : > { %v931_v63 = vpop.f32.mrf.mxu0 }
 0x112   : > { %1203 = vst.msk [vmem:[%s1879_s16 + $0x8] sm:$0xf] %vm1200_vm1, %v1194_v4  ;;  %v945_v5 = vadd.f32 %v931_v63, %v885_v16  ;;  %v1066_v11 = vpop.f32.mrf.mxu2  ;;  %v1177_v36 = vadd.f32 %v1176_v38, %v1170_v25 }
 0x114   : > { %v1018_v56 = vadd.f32 %v1004_v52, %v945_v5 }
 0x115   : > { %v1134_v3 = vpop.f32.mrf.mxu3 }
 0x116   : > { %v1150_v2 = vadd.f32 %v1134_v3, %v1077_v59  ;;  %v1078_v13 = vadd.f32 %v1064_v50, %v1018_v56  ;;  %v1009_v51 = vpop.f32.mrf.mxu1 }
 0x118   : > { %v1195_v14 = vpack.c.bf16 %v1150_v2, %v1150_v2  ;;  %v1171_v55 = vmul.f32 %v1150_v2, %v1150_v2  ;;  %v1157_v44 = vadd.f32 %v1156_v57, %v1150_v2 }
 0x119   : > { %v933_v20 = vpop.f32.mrf.mxu0 }
 0x11a   : > { %1204 = vst.msk [vmem:[%s1879_s16 + $0xc] sm:$0xf] %vm1200_vm1, %v1195_v14  ;;  %v946_v26 = vadd.f32 %v933_v20, %v886_v28  ;;  %v1069_v27 = vpop.f32.mrf.mxu2  ;;  %v1178_v61 = vadd.f32 %v1177_v36, %v1171_v55 }
 0x11c   : > { %v1019_v6 = vadd.f32 %v1006_v33, %v946_v26 }
 0x11d   : > { %v1137_v40 = vpop.f32.mrf.mxu3 }
 0x11e   : > { %v1151_v15 = vadd.f32 %v1137_v40, %v1078_v13  ;;  %v1079_v23 = vadd.f32 %v1066_v11, %v1019_v6  ;;  %v1011_v31 = vpop.f32.mrf.mxu1 }
 0x120   : > { %v1196_v42 = vpack.c.bf16 %v1151_v15, %v1151_v15  ;;  %v1172_v47 = vmul.f32 %v1151_v15, %v1151_v15  ;;  %v1158_v58 = vadd.f32 %v1157_v44, %v1151_v15 }
 0x121   : > { %v936_v12 = vpop.f32.mrf.mxu0 }
 0x122   : > { %1205 = vst.msk [vmem:[%s1879_s16 + $0x10] sm:$0xf] %vm1200_vm1, %v1196_v42  ;;  %v947_v32 = vadd.f32 %v936_v12, %v887_v22  ;;  %v1071_v53 = vpop.f32.mrf.mxu2  ;;  %v1179_v18 = vadd.f32 %v1178_v61, %v1172_v47 }
 0x124   : > { %v1020_v43 = vadd.f32 %v1009_v51, %v947_v32 }
 0x125   : > { %v1139_v19 = vpop.f32.mrf.mxu3 }
 0x126   : > { %v1152_v29 = vadd.f32 %v1139_v19, %v1079_v23  ;;  %v1080_v21 = vadd.f32 %v1069_v27, %v1020_v43 }
 0x128   : > { %v1197_v34 = vpack.c.bf16 %v1152_v29, %v1152_v29  ;;  %v1173_v39 = vmul.f32 %v1152_v29, %v1152_v29  ;;  %v1159_v0 = vadd.f32 %v1158_v58, %v1152_v29 }
 0x129   : > { %v938_v37 = vpop.f32.mrf.mxu0 }
 0x12a   : > { %1206 = vst.msk [vmem:[%s1879_s16 + $0x14] sm:$0xf] %vm1200_vm1, %v1197_v34  ;;  %v948_v49 = vadd.f32 %v938_v37, %v888_v60  ;;  %v1180_v45 = vadd.f32 %v1179_v18, %v1173_v39 }
 0x12c   : > { %v1021_v62 = vadd.f32 %v1011_v31, %v948_v49 }
 0x12d   : > { %v1142_v10 = vpop.f32.mrf.mxu3 }
 0x12e   : > { %v1153_v7 = vadd.f32 %v1142_v10, %v1080_v21  ;;  %v1081_v17 = vadd.f32 %v1071_v53, %v1021_v62 }
 0x130   : > { %v1198_v54 = vpack.c.bf16 %v1153_v7, %v1153_v7  ;;  %v1174_v52 = vmul.f32 %v1153_v7, %v1153_v7  ;;  %v1160_v4 = vadd.f32 %v1159_v0, %v1153_v7 }
 0x132   : > { %1207 = vst.msk [vmem:[%s1879_s16 + $0x18] sm:$0xf] %vm1200_vm1, %v1198_v54  ;;  %v1181_v35 = vadd.f32 %v1180_v45, %v1174_v52 }
 0x135   : > { %v1144_v16 = vpop.f32.mrf.mxu3 }
 0x136   : > { %v1154_v63 = vadd.f32 %v1144_v16, %v1081_v17 }
 0x138   : > { %v1161_v59 = vadd.f32 %v1160_v4, %v1154_v63  ;;  %v1175_v5 = vmul.f32 %v1154_v63, %v1154_v63  ;;  %v1199_v50 = vpack.c.bf16 %v1154_v63, %v1154_v63 }
 0x13a   : > { %v1162_v3 = vrot.slane %v1161_v59, 4  ;;  %v1182_v9 = vadd.f32 %v1181_v35, %v1175_v5  ;;  %1208 = vst.msk [vmem:[%s1879_s16 + $0x1c] sm:$0xf] %vm1200_vm1, %v1199_v50 }
 0x13c   : > { %v1163_v2 = vadd.f32 %v1162_v3, %v1161_v59  ;;  %v1183_v56 = vrot.slane %v1182_v9, 4 }
 0x13e   : > { %v1164_v28 = vrot.slane %v1163_v2, 2  ;;  %v1184_v14 = vadd.f32 %v1183_v56, %v1182_v9 }
 0x140   : > { %v1165_v33 = vadd.f32 %v1164_v28, %v1163_v2  ;;  %v1185_v20 = vrot.slane %v1184_v14, 2 }
 0x142   : > { %v1166_v8 = vrot.slane %v1165_v33, 1  ;;  %v1186_v13 = vadd.f32 %v1185_v20, %v1184_v14 }
 0x144   : > { %v1187_v26 = vrot.slane %v1186_v13, 1  ;;  %v1167_v11 = vadd.f32 %v1166_v8, %v1165_v33 }
 0x146   : > { %v1188_v40 = vadd.f32 %v1187_v26, %v1186_v13 }
 0x148   : > { %v1190_v1 = vsel %vm1189_vm12, %v1167_v11, %v1188_v40 }
 0x149   : > { %1191 = vst [vmem:[%s212_s20] sm:$0x3] %v1190_v1 }
 0x14a PF: > { %s14_s14 = sadd.s32 1, %s1431_s14   ;;  %s1956_s12 = smov %s1427_s13 }
 0x14b   : > { %p11_p5 = scmp.ge.s32.totalorder %s14_s14, 4   ;;  %s1957_s13 = smov %s1959_s15 }
 0x14d   :  { %13 = sbr.rel (!%p11_p5) target bundleno = 2 (0x2), region = 78 }

// kernel: unet_block_forward.7
= control target key start
LH: loop header
LB: loop body
LE: loop exit
PB: predicated region body
PF: predicated region fallthrough
CT: control target
= control target key end

     0   :  { %s81_s0 = inlined_call_operand.vmem [shape: bf16[16,128], index: 0, kind: input, shape index: {}]   ;;  %s82_s1 = inlined_call_operand.vmem [shape: f32[1,128], index: 1, kind: input, shape index: {}]   ;;  %s83_s2 = inlined_call_operand.vmem [shape: f32[1,128], index: 2, kind: input, shape index: {}]   ;;  %s84_s3 = inlined_call_operand.vmem [shape: bf16[16,128], index: 3, kind: output, shape index: {}]  }
   0x1   :  { %v39_v0 = vld [vmem:[%s81_s0] sm:$0xff]  }
   0x2   :  { %v47_v1 = vld [vmem:[%s82_s1] ss:$0 sm:$0xff]  ;;  %v40_v2 = vunpack.c.l.bf16 %v39_v0  ;;  %v41_v3 = vunpack.c.h.bf16 %v39_v0 }
   0x3   :  { %v48_v4 = vld [vmem:[%s83_s2] ss:$0 sm:$0xff] }
   0x4   :  { %v22_v5 = vmul.f32 %v47_v1, %v40_v2  ;;  %v23_v6 = vmul.f32 %v47_v1, %v41_v3 }
   0x6   :  { %v28_v7 = vadd.f32 %v48_v4, %v22_v5  ;;  %v29_v8 = vadd.f32 %v48_v4, %v23_v6 }
   0x8   :  { %v45_v9 = vpack.c.bf16 %v29_v8, %v28_v7 }
   0xa   :  { %46 = vst [vmem:[%s84_s3] sm:$0xff] %v45_v9  }

// kernel: unet_block_forward.6
= control target key start
LH: loop header
LB: loop body
LE: loop exit
PB: predicated region body
PF: predicated region fallthrough
CT: control target
= control target key end

     0   :  { %s1615_s12 = smov 0   ;;  %s1617_s13 = smov 0   ;;  %s2170_s0 = inlined_call_operand.vmem [shape: bf16[2,10,10,16], index: 0, kind: input, shape index: {}]   ;;  %s2171_s1 = inlined_call_operand.vmem [shape: bf16[12,16,128], index: 1, kind: input, shape index: {}]   ;;  %s2172_s2 = inlined_call_operand.vmem [shape: bf16[2,16,8,8], index: 2, kind: output, shape index: {0}]   ;;  %s2173_s3 = inlined_call_operand.vmem [shape: f32[2,1,2,128], index: 3, kind: output, shape index: {1}]  }
   0x1   :  { %s1619_s14 = smov 0  }
   0x2 LB: > { %s26_s15 = sadd.s32 1, %s1589_s13  ;;  %p1398_p0 = scmp.ge.s32.totalorder %s1593_s14, 1  ;;  %s1593_s14 = sphi %s1619_s14, %s14_s14   ;;  %s1589_s13 = sphi %s1617_s13, %s2179_s13   ;;  %s1585_s12 = sphi %s1615_s12, %s2178_s12  }
   0x3   : > { %p28_p1 = scmp.ge.s32.totalorder %s26_s15, 2  ;;  %p156_p2 = scmp.lt.s32.totalorder %s1593_s14, 3 }
   0x5   : > { %s2181_s15 = smov (%p28_p1, %s26_s15), 0  ;;  %p157_p3 = pnand %p1398_p0, %p156_p2 }
   0x6   : > { %p191_p4 = scmp.lt.s32.totalorder (!%p157_p3), %s1585_s12, 1 }
   0x7   : > { %160 = sbr.rel (%p157_p3) target bundleno = 378 (0x17a), region = 28 }
   0xc   : > { %v1537_v0 = vld [vmem:[%s2171_s1 + $0x18] sm:$0xff]  ;;  %v1534_v1 = vld [vmem:[%s2171_s1] sm:$0xff]  ;;  %v1536_v2 = vld [vmem:[%s2171_s1 + $0x10] sm:$0xff]  ;;  %s2183_s12 = smov (!%p191_p4, %s1585_s12), 1  ;;  %vm553_vm0 = vcmask 1042432   ;;  %vm436_vm1 = vcmask 130048  }
   0xd   : > { %v1535_v3 = vld [vmem:[%s2171_s1 + $0x8] sm:$0xff]  ;;  %v1541_v4 = vld [vmem:[%s2171_s1 + $0x38] sm:$0xff]  ;;  %v1538_v5 = vld [vmem:[%s2171_s1 + $0x20] sm:$0xff]  ;;  %692 = vmatpush.bf16.msra.mxu3 %v1537_v0  ;;  %523 = vmatpush.bf16.msra.mxu1 %v1534_v1  ;;  %s1546_s5 = smul.u32 80, %s2183_s12  ;;  %vm554_vm2 = vcmask 1046532   ;;  %s1533_s21 = sshll.u32 %s2183_s12, 6 }
   0xe   : > { %v1540_v6 = vld [vmem:[%s2171_s1 + $0x30] sm:$0xff]  ;;  %v1539_v7 = vld [vmem:[%s2171_s1 + $0x28] sm:$0xff]  ;;  %628 = vmatpush.bf16.msra.mxu2 %v1536_v2  ;;  %456 = vmatpush.bf16.msra.mxu0 %v1535_v3  ;;  %vm300_vm3 = vsmask.f32 3328  ;;  %vm1681_vm4 = vmor %vm553_vm0, %vm554_vm2  ;;  %vm301_vm5 = vsmask.f32 7440  ;;  %s2041_s24 = scalar_lea.vmem %s2172_s2, %s1533_s21 }
   0xf   : > { %s1663_s8 = scalar_lea.vmem %s2170_s0, %s1546_s5  ;;  %vm1702_vm6 = vmor %vm300_vm3, %vm301_vm5  ;;  %vm1253_vm7 = vcmask 60416   ;;  %s1402_s25 = sshll.u32 %s2183_s12, 1  ;;  %vm1234_vm8 = vcmask 1040384  }
  0x10   : > { %v220_v8 = vld [vmem:[%s1663_s8 + $0x8] sm:$0xf]  ;;  %v222_v9 = vld [vmem:[%s1663_s8 + $0x10] sm:$0xf]  ;;  %v218_v10 = vld [vmem:[%s1663_s8] sm:$0xf]  ;;  %s212_s28 = scalar_lea.vmem %s2173_s3, %s1402_s25 }
  0x11   : > { %957 = vmatpush.bf16.msrb.mxu3 %v1540_v6  ;;  %837 = vmatpush.bf16.msrb.mxu1 %v1539_v7  ;;  %v240_v11 = vunpack.c.l.bf16 %v220_v8  ;;  %v242_v12 = vunpack.c.l.bf16 %v222_v9  ;;  %v238_v13 = vunpack.c.l.bf16 %v218_v10  ;;  %v219_v14 = vld [vmem:[%s1663_s8 + $0x4] sm:$0x1]  ;;  %v221_v15 = vld [vmem:[%s1663_s8 + $0xc] sm:$0x1]  ;;  %v224_v16 = vld [vmem:[%s1663_s8 + $0x18] sm:$0xf] }
  0x12   : > { %922 = vmatpush.bf16.msrb.mxu2 %v1541_v4  ;;  %769 = vmatpush.bf16.msrb.mxu0 %v1538_v5  ;;  %v239_v17 = vunpack.c.l.bf16 %v219_v14  ;;  %v241_v18 = vunpack.c.l.bf16 %v221_v15  ;;  %v226_v19 = vld [vmem:[%s1663_s8 + $0x20] sm:$0xf]  ;;  %v244_v20 = vunpack.c.l.bf16 %v224_v16  ;;  %v223_v21 = vld [vmem:[%s1663_s8 + $0x14] sm:$0x1]  ;;  %v225_v26 = vld [vmem:[%s1663_s8 + $0x1c] sm:$0x1] }
  0x13   : > { %v260_v22 = vmax.f32 %v240_v11, 0.0  ;;  %v262_v23 = vmax.f32 %v242_v12, 0.0  ;;  %v258_v24 = vmax.f32 %v238_v13, 0.0  ;;  %v246_v25 = vunpack.c.l.bf16 %v226_v19 }
  0x14   : > { %v259_v27 = vmax.f32 %v239_v17, 0.0  ;;  %v261_v28 = vmax.f32 %v241_v18, 0.0  ;;  %v264_v29 = vmax.f32 %v244_v20, 0.0  ;;  %v243_v30 = vunpack.c.l.bf16 %v223_v21 }
  0x15   : > { %v280_v31 = vpack.c.bf16 %v260_v22, %v260_v22  ;;  %v1674_v32 = vpack.c.bf16 %v262_v23, %v262_v23  ;;  %v278_v33 = vpack.c.bf16 %v258_v24, %v258_v24  ;;  %v266_v34 = vmax.f32 %v246_v25, 0.0  ;;  %v228_v22 = vld [vmem:[%s1663_s8 + $0x28] sm:$0xf] }
  0x16   : > { %v279_v35 = vpack.c.bf16 %v259_v27, %v259_v27  ;;  %v281_v36 = vpack.c.bf16 %v261_v28, %v261_v28  ;;  %v1676_v37 = vpack.c.bf16 %v264_v29, %v264_v29  ;;  %v245_v38 = vunpack.c.l.bf16 %v225_v26  ;;  %v230_v27 = vld [vmem:[%s1663_s8 + $0x30] sm:$0xf] }
  0x17   : > { %v487_v39 = vunpack.c.l.b16 %v280_v31  ;;  %v488_v40 = vunpack.c.l.b16 %v1674_v32  ;;  %v486_v41 = vunpack.c.l.b16 %v278_v33  ;;  %v1421_v43 = vrot.slane %v278_v33, 9 }
  0x18   : > { %v558_v44 = vrot.slane %v279_v35, 5  ;;  %v1422_v45 = vrot.slane %v280_v31, 9  ;;  %v562_v46 = vrot.slane %v281_v36, 5  ;;  %v304_v47 = vshrl.u32 %v278_v33, 16 }
  0x19   : > { %v1685_v48 = vpack.c.b16 %v488_v40, %v487_v39  ;;  %v494_v49 = vpack.c.b16 %v487_v39, %v486_v41  ;;  %v307_v50 = vshll.u32 %v278_v33, 16  ;;  %v313_v51 = vshll.u32 %v279_v35, 16 }
  0x1a   : > { %v559_v52 = vsel %vm1681_vm4, %v1421_v43, %v558_v44  ;;  %v1691_v53 = vsel %vm1681_vm4, %v1422_v45, %v562_v46  ;;  %v306_v54 = vrot.slane %v304_v47, 4  ;;  %v318_v55 = vshrl.u32 %v280_v31, 16  ;;  %v229_v43 = vld [vmem:[%s1663_s8 + $0x2c] sm:$0x1] }
  0x1b   : > { %1445 = vmatmul.msk.bf16.vlgmr.msra.gmra.mxu3 %vm436_vm1, %v1685_v48  ;;  %1417 = vmatmul.msk.bf16.vlgmr.msra.gmra.mxu1 %vm436_vm1, %v494_v49  ;;  %v591_v56 = vunpack.c.l.b16 %v559_v52  ;;  %v592_v57 = vunpack.c.l.b16 %v1691_v53  ;;  %v309_v58 = vrot.slane %v307_v50, 5  ;;  %v321_v60 = vshll.u32 %v280_v31, 16 }
  0x1c   : > { %v320_v59 = vrot.slane %v318_v55, 4  ;;  %v327_v61 = vshll.u32 %v281_v36, 16  ;;  %v1697_v62 = vpack.c.bf16 %v266_v34, %v266_v34  ;;  %v315_v1 = vrot.slane %v313_v51, 5 }
  0x1d   : > { %v599_v63 = vpack.c.b16 %v592_v57, %v591_v56  ;;  %v310_v0 = vor.u32 %v309_v58, %v306_v54  ;;  %v263_v2 = vmax.f32 %v243_v30, 0.0  ;;  %v323_v4 = vrot.slane %v321_v60, 5 }
  0x1e   : > { %v489_v5 = vunpack.c.l.b16 %v1676_v37  ;;  %v265_v6 = vmax.f32 %v245_v38, 0.0  ;;  %v329_v8 = vrot.slane %v327_v61, 5  ;;  %v490_v9 = vunpack.c.l.b16 %v1697_v62 }
  0x1f   : > { %1435 = vmatmul.msk.bf16.vlgmr.msra.gmra.mxu2 %vm436_vm1, %v599_v63  ;;  %v311_v7 = vrot.slane %v310_v0, 4  ;;  %v283_v10 = vpack.c.bf16 %v263_v2, %v263_v2  ;;  %v324_v11 = vor.u32 %v323_v4, %v320_v59  ;;  %v1423_v13 = vrot.slane %v1674_v32, 9 }
  0x20   : > { %v285_v12 = vpack.c.bf16 %v265_v6, %v265_v6  ;;  %v1424_v14 = vrot.slane %v1676_v37, 9  ;;  %v332_v17 = vshrl.u32 %v1674_v32, 16  ;;  %v335_v18 = vshll.u32 %v1674_v32, 16  ;;  %v227_v32 = vld [vmem:[%s1663_s8 + $0x24] sm:$0x1] }
  0x21   : > { %v316_v15 = vsel %vm1702_vm6, %v311_v7, %v315_v1  ;;  %v566_v16 = vrot.slane %v283_v10, 5  ;;  %v325_v19 = vrot.slane %v324_v11, 4  ;;  %v1715_v20 = vpack.c.b16 %v489_v5, %v488_v40 }
  0x22   : > { %v570_v21 = vrot.slane %v285_v12, 5  ;;  %v418_v23 = vunpack.c.l.b16 %v316_v15  ;;  %v334_v24 = vrot.slane %v332_v17, 4  ;;  %v337_v25 = vrot.slane %v335_v18, 5 }
  0x23   : > { %v346_v26 = vshrl.u32 %v1676_v37, 16  ;;  %v330_v28 = vsel %vm1702_vm6, %v325_v19, %v329_v8  ;;  %v1724_v29 = vsel %vm1681_vm4, %v1423_v13, %v566_v16  ;;  %v341_v31 = vshll.u32 %v283_v10, 16 }
  0x24   : > { %v1728_v30 = vsel %vm1681_vm4, %v1424_v14, %v570_v21  ;;  %v1731_v33 = vunpack.c.l.b16 %v330_v28  ;;  %v1735_v34 = vpack.c.b16 %v490_v9, %v489_v5  ;;  %v338_v35 = vor.u32 %v337_v25, %v334_v24 }
  0x25   : > { %v348_v36 = vrot.slane %v346_v26, 4  ;;  %v349_v38 = vshll.u32 %v1676_v37, 16  ;;  %v355_v39 = vshll.u32 %v285_v12, 16  ;;  %v248_v40 = vunpack.c.l.bf16 %v228_v22  ;;  %v232_v12 = vld [vmem:[%s1663_s8 + $0x38] sm:$0xf] }
  0x26   : > { %v250_v41 = vunpack.c.l.bf16 %v230_v27  ;;  %v426_v44 = vpack.c.b16 %v1731_v33, %v418_v23  ;;  %v593_v45 = vunpack.c.l.b16 %v1724_v29  ;;  %v594_v46 = vunpack.c.l.b16 %v1728_v30  ;;  %v231_v22 = vld [vmem:[%s1663_s8 + $0x34] sm:$0x1]  ;;  %v233_v27 = vld [vmem:[%s1663_s8 + $0x3c] sm:$0x1] }
  0x27   : > { %v247_v47 = vunpack.c.l.bf16 %v227_v32  ;;  %v339_v49 = vrot.slane %v338_v35, 4  ;;  %v343_v50 = vrot.slane %v341_v31, 5  ;;  %v351_v51 = vrot.slane %v349_v38, 5  ;;  %v234_v32 = vld [vmem:[%s1663_s8 + $0x40] sm:$0xf] }
  0x28   : > { %v268_v52 = vmax.f32 %v248_v40, 0.0  ;;  %1409 = vmatmul.msk.bf16.vlgmr.msra.gmra.mxu0 %vm436_vm1, %v426_v44  ;;  %v249_v54 = vunpack.c.l.bf16 %v229_v43  ;;  %v357_v56 = vrot.slane %v355_v39, 5  ;;  %v270_v58 = vmax.f32 %v250_v41, 0.0 }
  0x29   : > { %v267_v55 = vmax.f32 %v247_v47, 0.0  ;;  %v352_v37 = vor.u32 %v351_v51, %v348_v36  ;;  %v1751_v59 = vpack.c.b16 %v594_v46, %v593_v45  ;;  %v344_v63 = vsel %vm1702_vm6, %v339_v49, %v343_v50 }
  0x2a   : > { %v288_v60 = vpack.c.bf16 %v268_v52, %v268_v52  ;;  %v269_v61 = vmax.f32 %v249_v54, 0.0  ;;  %v360_v4 = vshrl.u32 %v1697_v62, 16  ;;  %v363_v5 = vshll.u32 %v1697_v62, 16 }
  0x2b   : > { %1446 = vmatmul.msk.bf16.gmra.mxu3 %vm436_vm1, %v1735_v34  ;;  %1418 = vmatmul.msk.bf16.gmra.mxu1 %vm436_vm1, %v1715_v20  ;;  %v353_v0 = vrot.slane %v352_v37, 4  ;;  %v287_v1 = vpack.c.bf16 %v267_v55, %v267_v55  ;;  %v1759_v7 = vpack.c.bf16 %v270_v58, %v270_v58  ;;  %v1763_v8 = vunpack.c.l.b16 %v344_v63 }
  0x2c   : > { %v289_v2 = vpack.c.bf16 %v269_v61, %v269_v61  ;;  %v1425_v10 = vrot.slane %v1697_v62, 9  ;;  %v1426_v11 = vrot.slane %v288_v60, 9  ;;  %v374_v15 = vshrl.u32 %v288_v60, 16 }
  0x2d   : > { %v358_v6 = vsel %vm1702_vm6, %v353_v0, %v357_v56  ;;  %v574_v13 = vrot.slane %v287_v1, 5  ;;  %v377_v16 = vshll.u32 %v288_v60, 16  ;;  %v491_v18 = vunpack.c.l.b16 %v288_v60 }
  0x2e   : > { %v578_v14 = vrot.slane %v289_v2, 5  ;;  %v1767_v17 = vunpack.c.l.b16 %v358_v6  ;;  %v362_v19 = vrot.slane %v360_v4, 4  ;;  %v365_v21 = vrot.slane %v363_v5, 5 }
  0x2f   : > { %1436 = vmatmul.msk.bf16.gmra.mxu2 %vm436_vm1, %v1751_v59  ;;  %v492_v23 = vunpack.c.l.b16 %v1759_v7  ;;  %v376_v24 = vrot.slane %v374_v15, 4  ;;  %v379_v25 = vrot.slane %v377_v16, 5  ;;  %v252_v26 = vunpack.c.l.bf16 %v232_v12  ;;  %v1544_v12 = vld [vmem:[%s2171_s1 + $0x50] sm:$0xff] }
  0x30   : > { %v1774_v28 = vsel %vm1681_vm4, %v1425_v10, %v574_v13  ;;  %v1778_v31 = vsel %vm1681_vm4, %v1426_v11, %v578_v14  ;;  %v251_v35 = vunpack.c.l.bf16 %v231_v22  ;;  %v1783_v36 = vpack.c.b16 %v1767_v17, %v1763_v8  ;;  %1112 = vmatpush.bf16.msra.mxu2 %v1544_v12 }
  0x31   : > { %v366_v38 = vor.u32 %v365_v21, %v362_v19  ;;  %v369_v39 = vshll.u32 %v287_v1, 16  ;;  %v253_v40 = vunpack.c.l.bf16 %v233_v27  ;;  %v1787_v41 = vpack.c.b16 %v492_v23, %v491_v18 }
  0x32   : > { %v380_v43 = vor.u32 %v379_v25, %v376_v24  ;;  %v383_v44 = vshll.u32 %v289_v2, 16  ;;  %v272_v47 = vmax.f32 %v252_v26, 0.0  ;;  %v1791_v49 = vpack.c.b16 %v491_v18, %v490_v9 }
  0x33   : > { %v595_v50 = vunpack.c.l.b16 %v1774_v28  ;;  %v596_v51 = vunpack.c.l.b16 %v1778_v31  ;;  %v254_v52 = vunpack.c.l.bf16 %v234_v32  ;;  %v271_v54 = vmax.f32 %v251_v35, 0.0 }
  0x34   : > { %v273_v55 = vmax.f32 %v253_v40, 0.0  ;;  %v367_v37 = vrot.slane %v366_v38, 4  ;;  %v371_v56 = vrot.slane %v369_v39, 5  ;;  %v381_v58 = vrot.slane %v380_v43, 4 }
  0x35   : > { %v385_v60 = vrot.slane %v383_v44, 5  ;;  %v292_v61 = vpack.c.bf16 %v272_v47, %v272_v47  ;;  %v1805_v62 = vpack.c.b16 %v596_v51, %v595_v50  ;;  %v274_v9 = vmax.f32 %v254_v52, 0.0 }
  0x36   : > { %v291_v63 = vpack.c.bf16 %v271_v54, %v271_v54  ;;  %v293_v0 = vpack.c.bf16 %v273_v55, %v273_v55  ;;  %v372_v1 = vsel %vm1702_vm6, %v367_v37, %v371_v56  ;;  %v388_v2 = vshrl.u32 %v1759_v7, 16  ;;  %v1542_v37 = vld [vmem:[%s2171_s1 + $0x40] sm:$0xff]  ;;  %v1545_v56 = vld [vmem:[%s2171_s1 + $0x58] sm:$0xff] }
  0x37   : > { %v386_v4 = vsel %vm1702_vm6, %v381_v58, %v385_v60  ;;  %v391_v5 = vshll.u32 %v1759_v7, 16  ;;  %v402_v6 = vshrl.u32 %v292_v61, 16  ;;  %v405_v10 = vshll.u32 %v292_v61, 16  ;;  %995 = vmatpush.bf16.msra.mxu0 %v1542_v37  ;;  %1168 = vmatpush.bf16.msra.mxu3 %v1545_v56 }
  0x38   : > { %1410 = vmatmul.msk.bf16.gmra.mxu0 %vm436_vm1, %v1783_v36  ;;  %v1815_v11 = vpack.c.bf16 %v274_v9, %v274_v9  ;;  %v1427_v13 = vrot.slane %v1759_v7, 9  ;;  %v582_v14 = vrot.slane %v291_v63, 5  ;;  %v1428_v15 = vrot.slane %v292_v61, 9  ;;  %v1543_v7 = vld [vmem:[%s2171_s1 + $0x48] sm:$0xff] }
  0x39   : > { %v586_v16 = vrot.slane %v293_v0, 5  ;;  %v422_v18 = vunpack.c.l.b16 %v372_v1  ;;  %v1821_v19 = vunpack.c.l.b16 %v386_v4  ;;  %v390_v21 = vrot.slane %v388_v2, 4  ;;  %1047 = vmatpush.bf16.msra.mxu1 %v1543_v7 }
  0x3a   : > { %v393_v22 = vrot.slane %v391_v5, 5  ;;  %v404_v24 = vrot.slane %v402_v6, 4  ;;  %v407_v25 = vrot.slane %v405_v10, 5  ;;  %v493_v26 = vunpack.c.l.b16 %v292_v61 }
  0x3b   : > { %1447 = vmatmul.msk.bf16.gmra.mxu3 %vm436_vm1, %v1787_v41  ;;  %1419 = vmatmul.msk.bf16.gmra.mxu1 %vm436_vm1, %v1791_v49  ;;  %v662_v27 = vunpack.c.l.b16 %v1815_v11  ;;  %v583_v32 = vsel %vm1681_vm4, %v1427_v13, %v582_v14  ;;  %v1828_v35 = vsel %vm1681_vm4, %v1428_v15, %v586_v16  ;;  %v1831_v38 = vpack.c.b16 %v1821_v19, %v422_v18 }
  0x3c   : > { %v394_v39 = vor.u32 %v393_v22, %v390_v21  ;;  %v397_v40 = vshll.u32 %v291_v63, 16  ;;  %v408_v43 = vor.u32 %v407_v25, %v404_v24  ;;  %v411_v44 = vshll.u32 %v293_v0, 16 }
  0x3d   : > { %v666_v47 = vpack.c.b16 %v662_v27, %v493_v26  ;;  %v1837_v52 = vpack.c.b16 %v493_v26, %v492_v23  ;;  %v597_v54 = vunpack.c.l.b16 %v583_v32  ;;  %v598_v55 = vunpack.c.l.b16 %v1828_v35  ;;  %v236_v26 = vld [vmem:[%s1663_s8 + $0x48] sm:$0xf] }
  0x3e   : > { %v395_v23 = vrot.slane %v394_v39, 4  ;;  %v399_v58 = vrot.slane %v397_v40, 5  ;;  %v409_v60 = vrot.slane %v408_v43, 4  ;;  %v413_v61 = vrot.slane %v411_v44, 5  ;;  %v237_v40 = vld [vmem:[%s1663_s8 + $0x4c] sm:$0x1] }
  0x3f   : > { %1437 = vmatmul.msk.bf16.gmra.mxu2 %vm436_vm1, %v1805_v62  ;;  %v1854_v9 = vpack.c.b16 %v598_v55, %v597_v54  ;;  %v808_v5 = vpack.c.b16 %v593_v45, %v592_v57  ;;  %v740_v6 = vpack.c.b16 %v1763_v8, %v1731_v33  ;;  %v1880_v53 = vpack.c.b16 %v595_v50, %v594_v46  ;;  %v235_v57 = vld [vmem:[%s1663_s8 + $0x44] sm:$0x1] }
  0x40   : > { %v400_v63 = vsel %vm1702_vm6, %v395_v23, %v399_v58  ;;  %v414_v0 = vsel %vm1702_vm6, %v409_v60, %v413_v61  ;;  %v255_v29 = vunpack.c.l.bf16 %v235_v57  ;;  %v723_v30 = vshrl.u32 %v1815_v11, 16 }
  0x41   : > { %v424_v1 = vunpack.c.l.b16 %v400_v63  ;;  %v425_v2 = vunpack.c.l.b16 %v414_v0  ;;  %v726_v45 = vshll.u32 %v1815_v11, 16  ;;  %v1894_v46 = vpack.c.b16 %v597_v54, %v596_v51 }
  0x42   : > { %v275_v33 = vmax.f32 %v255_v29, 0.0  ;;  %v1459_v50 = vrot.slane %v1815_v11, 9  ;;  %v257_v54 = vunpack.c.l.bf16 %v237_v40 }
  0x43   : > { %v1862_v4 = vpack.c.b16 %v425_v2, %v424_v1  ;;  %v728_v28 = vrot.slane %v726_v45, 5 }
  0x44   : > { %v295_v8 = vpack.c.bf16 %v275_v33, %v275_v33  ;;  %v277_v56 = vmax.f32 %v257_v54, 0.0 }
  0x46   : > { %v802_v10 = vrot.slane %v295_v8, 5  ;;  %v732_v31 = vshll.u32 %v295_v8, 16  ;;  %v297_v60 = vpack.c.bf16 %v277_v56, %v277_v56 }
  0x48   : > { %1411 = vmatmul.msk.bf16.gmra.mxu0 %vm436_vm1, %v1831_v38  ;;  %v1906_v51 = vsel %vm1681_vm4, %v1459_v50, %v802_v10  ;;  %v734_v14 = vrot.slane %v732_v31, 5 }
  0x4b   : > { %1448 = vmatmul.msk.bf16.gmra.mxu3 %vm436_vm1, %v666_v47  ;;  %1420 = vmatmul.msk.bf16.gmra.mxu1 %vm436_vm1, %v1837_v52 }
  0x4f   : > { %1438 = vmatmul.msk.bf16.gmra.mxu2 %vm436_vm1, %v1854_v9 }
  0x58   : > { %1412 = vmatmul.msk.bf16.gmra.mxu0 %vm436_vm1, %v1862_v4 }
  0x5b   : > { %1486 = vmatmul.msk.bf16.vlgmr.msrb.gmra.mxu3 %vm436_vm1, %v1685_v48  ;;  %1466 = vmatmul.msk.bf16.vlgmr.msrb.gmra.mxu1 %vm436_vm1, %v808_v5  ;;  %v741_v48 = vpack.c.b16 %v422_v18, %v1767_v17  ;;  %v742_v17 = vpack.c.b16 %v424_v1, %v1821_v19  ;;  %v1145_v1 = vrot.slane %v297_v60, 5 }
  0x5f   : > { %1478 = vmatmul.msk.bf16.vlgmr.msrb.gmra.mxu2 %vm436_vm1, %v740_v6 }
  0x68   : > { %1455 = vmatmul.msk.bf16.vlgmr.msrb.gmra.mxu0 %vm436_vm1, %v740_v6 }
  0x6b   : > { %1487 = vmatmul.msk.bf16.gmra.mxu3 %vm436_vm1, %v1735_v34  ;;  %1467 = vmatmul.msk.bf16.gmra.mxu1 %vm436_vm1, %v1880_v53  ;;  %v725_v34 = vrot.slane %v723_v30, 4 }
  0x6d   : > { %v729_v12 = vor.u32 %v728_v28, %v725_v34 }
  0x6f   : > { %1479 = vmatmul.msk.bf16.gmra.mxu2 %vm436_vm1, %v741_v48  ;;  %v730_v13 = vrot.slane %v729_v12, 4 }
  0x71   : > { %v735_v15 = vsel %vm1702_vm6, %v730_v13, %v734_v14 }
  0x72   : > { %v1915_v18 = vunpack.c.l.b16 %v735_v15 }
  0x74   : > { %v743_v19 = vpack.c.b16 %v1915_v18, %v425_v2 }
  0x78   : > { %1456 = vmatmul.msk.bf16.gmra.mxu0 %vm436_vm1, %v741_v48 }
  0x7b   : > { %1488 = vmatmul.msk.bf16.gmra.mxu3 %vm436_vm1, %v1787_v41  ;;  %1468 = vmatmul.msk.bf16.gmra.mxu1 %vm436_vm1, %v1894_v46  ;;  %v807_v41 = vunpack.c.l.b16 %v1906_v51 }
  0x7d   : > { %v1913_v16 = vpack.c.b16 %v807_v41, %v598_v55 }
  0x7f   : > { %1480 = vmatmul.msk.bf16.gmra.mxu2 %vm436_vm1, %v742_v17 }
  0x88   : > { %1457 = vmatmul.msk.bf16.gmra.mxu0 %vm436_vm1, %v742_v17 }
  0x8b   : > { %1489 = vmatmul.msk.bf16.gmra.mxu3 %vm436_vm1, %v666_v47  ;;  %1469 = vmatmul.msk.bf16.gmra.mxu1 %vm436_vm1, %v1913_v16 }
  0x8f   : > { %1481 = vmatmul.msk.bf16.gmra.mxu2 %vm436_vm1, %v743_v19 }
  0x98   : > { %v1923_v21 = vpop.f32.mrf.mxu1  ;;  %1458 = vmatmul.msk.bf16.gmra.mxu0 %vm436_vm1, %v743_v19 }
  0x9b   : > { %1527 = vmatmul.msk.bf16.vlgmr.msra.gmra.mxu3 %vm436_vm1, %v1751_v59  ;;  %1506 = vmatmul.msk.bf16.vlgmr.msra.gmra.mxu1 %vm436_vm1, %v1715_v20  ;;  %v256_v59 = vunpack.c.l.bf16 %v236_v26 }
  0x9e   : > { %v1930_v22 = vpop.f32.mrf.mxu3 }
  0x9f   : > { %1516 = vmatmul.msk.bf16.vlgmr.msra.gmra.mxu2 %vm436_vm1, %v1783_v36  ;;  %v276_v36 = vmax.f32 %v256_v59, 0.0 }
  0xa0   : > { %v1934_v24 = vpop.f32.mrf.mxu1 }
  0xa1   : > { %v296_v55 = vpack.c.bf16 %v276_v36, %v276_v36 }
  0xa2   : > { %v1936_v25 = vpop.f32.mrf.mxu2 }
  0xa3   : > { %v1078_v7 = vshrl.u32 %v296_v55, 16  ;;  %v1520_v0 = vrot.slane %v296_v55, 9  ;;  %v1029_v30 = vunpack.c.l.b16 %v296_v55 }
  0xa5   : > { %v1939_v32 = vpop.f32.mrf.mxu0  ;;  %v1080_v61 = vrot.slane %v1078_v7, 4  ;;  %v1146_v57 = vsel %vm1681_vm4, %v1520_v0, %v1145_v1  ;;  %v1030_v42 = vpack.c.b16 %v1029_v30, %v662_v27 }
  0xa6   : > { %v1941_v35 = vpop.f32.mrf.mxu3  ;;  %v526_v14 = vadd.f32 %v1923_v21, %v1939_v32 }
  0xa8   : > { %v1943_v39 = vpop.f32.mrf.mxu1  ;;  %1496 = vmatmul.msk.bf16.vlgmr.msra.gmra.mxu0 %vm436_vm1, %v808_v5  ;;  %v1087_v5 = vshll.u32 %v297_v60, 16  ;;  %v650_v19 = vadd.f32 %v1936_v25, %v526_v14 }
  0xaa   : > { %v1946_v20 = vpop.f32.mrf.mxu2  ;;  %v1089_v29 = vrot.slane %v1087_v5, 5  ;;  %v714_v36 = vadd.f32 %v1930_v22, %v650_v19 }
  0xab   : > { %1528 = vmatmul.msk.bf16.gmra.mxu3 %vm436_vm1, %v1805_v62  ;;  %1507 = vmatmul.msk.bf16.gmra.mxu1 %vm436_vm1, %v1791_v49  ;;  %v1081_v62 = vshll.u32 %v296_v55, 16 }
  0xad   : > { %v460_v43 = vpop.f32.mrf.mxu0  ;;  %v1083_v63 = vrot.slane %v1081_v62, 5 }
  0xae   : > { %v1953_v44 = vpop.f32.mrf.mxu3  ;;  %v528_v59 = vadd.f32 %v1934_v24, %v460_v43 }
  0xaf   : > { %1517 = vmatmul.msk.bf16.gmra.mxu2 %vm436_vm1, %v1831_v38  ;;  %v1084_v2 = vor.u32 %v1083_v63, %v1080_v61 }
  0xb0   : > { %v1957_v47 = vpop.f32.mrf.mxu1  ;;  %v651_v21 = vadd.f32 %v1946_v20, %v528_v59 }
  0xb2   : > { %v1959_v37 = vpop.f32.mrf.mxu2  ;;  %v715_v43 = vadd.f32 %v1941_v35, %v651_v21 }
  0xb5   : > { %v1961_v23 = vpop.f32.mrf.mxu0 }
  0xb6   : > { %v1963_v49 = vpop.f32.mrf.mxu3  ;;  %v531_v22 = vadd.f32 %v1943_v39, %v1961_v23 }
  0xb8   : > { %v1965_v58 = vpop.f32.mrf.mxu1  ;;  %1497 = vmatmul.msk.bf16.gmra.mxu0 %vm436_vm1, %v1880_v53  ;;  %v652_v60 = vadd.f32 %v1959_v37, %v531_v22 }
  0xba   : > { %v1969_v38 = vpop.f32.mrf.mxu2  ;;  %v716_v35 = vadd.f32 %v1953_v44, %v652_v60 }
  0xbb   : > { %1529 = vmatmul.msk.bf16.gmra.mxu3 %vm436_vm1, %v1854_v9  ;;  %1508 = vmatmul.msk.bf16.gmra.mxu1 %vm436_vm1, %v1837_v52  ;;  %v1085_v9 = vrot.slane %v1084_v2, 4  ;;  %v1150_v52 = vunpack.c.l.b16 %v1146_v57 }
  0xbd   : > { %v1975_v6 = vpop.f32.mrf.mxu0  ;;  %v1090_v45 = vsel %vm1702_vm6, %v1085_v9, %v1089_v29 }
  0xbe   : > { %v1977_v48 = vpop.f32.mrf.mxu3  ;;  %v1094_v28 = vunpack.c.l.b16 %v1090_v45  ;;  %v533_v39 = vadd.f32 %v1957_v47, %v1975_v6 }
  0xbf   : > { %1518 = vmatmul.msk.bf16.gmra.mxu2 %vm436_vm1, %v1862_v4  ;;  %v1151_v4 = vpack.c.b16 %v1150_v52, %v807_v41 }
  0xc0   : > { %v1981_v53 = vpop.f32.mrf.mxu1  ;;  %v1095_v3 = vpack.c.b16 %v1094_v28, %v1915_v18  ;;  %v653_v52 = vadd.f32 %v1969_v38, %v533_v39 }
  0xc2   : > { %v1985_v33 = vpop.f32.mrf.mxu2  ;;  %v717_v44 = vadd.f32 %v1963_v49, %v653_v52 }
  0xc5   : > { %v1989_v8 = vpop.f32.mrf.mxu0 }
  0xc6   : > { %v1991_v34 = vpop.f32.mrf.mxu3  ;;  %v536_v47 = vadd.f32 %v1965_v58, %v1989_v8 }
  0xc8   : > { %v1997_v17 = vpop.f32.mrf.mxu1  ;;  %1498 = vmatmul.msk.bf16.gmra.mxu0 %vm436_vm1, %v1894_v46 }
  0xca   : > { %v2001_v50 = vpop.f32.mrf.mxu2 }
  0xcb   : > { %1530 = vmatmul.msk.bf16.gmra.mxu3 %vm436_vm1, %v1151_v4  ;;  %1509 = vmatmul.msk.bf16.gmra.mxu1 %vm436_vm1, %v1030_v42 }
  0xcd   : > { %v2006_v10 = vpop.f32.mrf.mxu0 }
  0xce   : > { %v2008_v12 = vpop.f32.mrf.mxu3  ;;  %v538_v58 = vadd.f32 %v1981_v53, %v2006_v10 }
  0xcf   : > { %1519 = vmatmul.msk.bf16.gmra.mxu2 %vm436_vm1, %v1095_v3 }
  0xd0   : > { %v2011_v11 = vpop.f32.mrf.mxu1 }
  0xd2   : > { %v2013_v27 = vpop.f32.mrf.mxu2 }
  0xd5   : > { %v2015_v46 = vpop.f32.mrf.mxu0 }
  0xd6   : > { %v2017_v31 = vpop.f32.mrf.mxu3  ;;  %v541_v53 = vadd.f32 %v1997_v17, %v2015_v46 }
  0xd8   : > { %v839_v51 = vpop.f32.mrf.mxu1  ;;  %1499 = vmatmul.msk.bf16.gmra.mxu0 %vm436_vm1, %v1913_v16 }
  0xda   : > { %v2021_v13 = vpop.f32.mrf.mxu2 }
  0xdd   : > { %v2025_v41 = vpop.f32.mrf.mxu0 }
  0xde   : > { %v2027_v15 = vpop.f32.mrf.mxu3  ;;  %v543_v17 = vadd.f32 %v2011_v11, %v2025_v41 }
  0xe0   : > { %v841_v18 = vpop.f32.mrf.mxu1 }
  0xe2   : > { %v2030_v26 = vpop.f32.mrf.mxu2 }
  0xe5   : > { %v771_v40 = vpop.f32.mrf.mxu0 }
  0xe6   : > { %v2034_v16 = vpop.f32.mrf.mxu3  ;;  %v791_v54 = vadd.f32 %v771_v40, %v714_v36 }
  0xe8   : > { %v844_v55 = vpop.f32.mrf.mxu1  ;;  %v859_v32 = vadd.f32 %v839_v51, %v791_v54 }
  0xea   : > { %v2043_v25 = vpop.f32.mrf.mxu2  ;;  %v1237_v24 = vpack.c.bf16 %v859_v32, %v859_v32  ;;  %v881_v0 = vmul.f32 %v859_v32, %v859_v32 }
  0xec   : > { %1254 = vst.msk [vmem:[%s2041_s24] sm:$0xf] %vm1253_vm7, %v1237_v24  ;;  %v655_v24 = vadd.f32 %v2001_v50, %v538_v58 }
  0xed   : > { %v773_v20 = vpop.f32.mrf.mxu0 }
  0xee   : > { %v2050_v56 = vpop.f32.mrf.mxu3  ;;  %v792_v7 = vadd.f32 %v773_v20, %v715_v43 }
  0xf0   : > { %v846_v62 = vpop.f32.mrf.mxu1  ;;  %v860_v61 = vadd.f32 %v841_v18, %v792_v7  ;;  %v654_v18 = vadd.f32 %v1985_v33, %v536_v47 }
  0xf2   : > { %v2053_v63 = vpop.f32.mrf.mxu2  ;;  %v867_v1 = vadd.f32 %v860_v61, %v859_v32  ;;  %v882_v2 = vmul.f32 %v860_v61, %v860_v61  ;;  %v1239_v5 = vpack.c.bf16 %v860_v61, %v860_v61  ;;  %v718_v49 = vadd.f32 %v1977_v48, %v654_v18 }
  0xf3   : > { %v719_v48 = vadd.f32 %v1991_v34, %v655_v24 }
  0xf4   : > { %v889_v23 = vadd.f32 %v882_v2, %v881_v0  ;;  %1256 = vst.msk [vmem:[%s2041_s24 + $0x8] sm:$0xf] %vm1253_vm7, %v1239_v5 }
  0xf5   : > { %v776_v57 = vpop.f32.mrf.mxu0 }
  0xf6   : > { %v2060_v9 = vpop.f32.mrf.mxu3  ;;  %v793_v37 = vadd.f32 %v776_v57, %v716_v35 }
  0xf8   : > { %v849_v29 = vpop.f32.mrf.mxu1  ;;  %v861_v30 = vadd.f32 %v844_v55, %v793_v37 }
  0xfa   : > { %v2063_v45 = vpop.f32.mrf.mxu2  ;;  %v868_v4 = vadd.f32 %v867_v1, %v861_v30  ;;  %v883_v42 = vmul.f32 %v861_v30, %v861_v30  ;;  %v1241_v28 = vpack.c.bf16 %v861_v30, %v861_v30  ;;  %v656_v1 = vadd.f32 %v2013_v27, %v541_v53 }
  0xfb   : > { %v657_v27 = vadd.f32 %v2021_v13, %v543_v17 }
  0xfc   : > { %v890_v6 = vadd.f32 %v889_v23, %v883_v42  ;;  %1258 = vst.msk [vmem:[%s2041_s24 + $0x10] sm:$0xf] %vm1253_vm7, %v1241_v28  ;;  %v720_v34 = vadd.f32 %v2008_v12, %v656_v1 }
  0xfd   : > { %v778_v3 = vpop.f32.mrf.mxu0  ;;  %v721_v41 = vadd.f32 %v2017_v31, %v657_v27 }
  0xfe   : > { %v2070_v51 = vpop.f32.mrf.mxu3  ;;  %v794_v14 = vadd.f32 %v778_v3, %v717_v44 }
 0x100   : > { %v851_v38 = vpop.f32.mrf.mxu1  ;;  %v862_v19 = vadd.f32 %v846_v62, %v794_v14 }
 0x102   : > { %v2073_v59 = vpop.f32.mrf.mxu2  ;;  %v869_v36 = vadd.f32 %v868_v4, %v862_v19  ;;  %v884_v40 = vmul.f32 %v862_v19, %v862_v19  ;;  %v1243_v54 = vpack.c.bf16 %v862_v19, %v862_v19 }
 0x103   : > { %v970_v27 = vadd.f32 %v2070_v51, %v2073_v59 }
 0x104   : > { %v891_v8 = vadd.f32 %v890_v6, %v884_v40  ;;  %1260 = vst.msk [vmem:[%s2041_s24 + $0x18] sm:$0xf] %vm1253_vm7, %v1243_v54 }
 0x105   : > { %v781_v55 = vpop.f32.mrf.mxu0 }
 0x106   : > { %v2080_v21 = vpop.f32.mrf.mxu3  ;;  %v795_v32 = vadd.f32 %v781_v55, %v718_v49 }
 0x108   : > { %v854_v33 = vpop.f32.mrf.mxu1  ;;  %v863_v22 = vadd.f32 %v849_v29, %v795_v32 }
 0x10a   : > { %v2083_v43 = vpop.f32.mrf.mxu2  ;;  %v870_v20 = vadd.f32 %v869_v36, %v863_v22  ;;  %v885_v7 = vmul.f32 %v863_v22, %v863_v22  ;;  %v1245_v62 = vpack.c.bf16 %v863_v22, %v863_v22  ;;  %v960_v36 = vadd.f32 %v2027_v15, %v2030_v26 }
 0x10c   : > { %v892_v10 = vadd.f32 %v891_v8, %v885_v7  ;;  %1262 = vst.msk [vmem:[%s2041_s24 + $0x20] sm:$0xf] %vm1253_vm7, %v1245_v62 }
 0x10d   : > { %v783_v60 = vpop.f32.mrf.mxu0 }
 0x10e   : > { %v2090_v61 = vpop.f32.mrf.mxu3  ;;  %v796_v0 = vadd.f32 %v783_v60, %v719_v48 }
 0x110   : > { %v856_v50 = vpop.f32.mrf.mxu1  ;;  %v864_v2 = vadd.f32 %v851_v38, %v796_v0 }
 0x112   : > { %v2093_v5 = vpop.f32.mrf.mxu2  ;;  %v871_v39 = vadd.f32 %v870_v20, %v864_v2  ;;  %v886_v23 = vmul.f32 %v864_v2, %v864_v2  ;;  %v1247_v35 = vpack.c.bf16 %v864_v2, %v864_v2 }
 0x114   : > { %v893_v46 = vadd.f32 %v892_v10, %v886_v23  ;;  %1264 = vst.msk [vmem:[%s2041_s24 + $0x28] sm:$0xf] %vm1253_vm7, %v1247_v35  ;;  %v965_v10 = vadd.f32 %v2050_v56, %v2053_v63  ;;  %v967_v23 = vadd.f32 %v2060_v9, %v2063_v45 }
 0x115   : > { %v786_v57 = vpop.f32.mrf.mxu0 }
 0x116   : > { %v2100_v37 = vpop.f32.mrf.mxu3  ;;  %v797_v29 = vadd.f32 %v786_v57, %v720_v34 }
 0x118   : > { %v865_v52 = vadd.f32 %v854_v33, %v797_v29  ;;  %v1049_v4 = vpop.f32.mrf.mxu1  ;;  %v962_v33 = vadd.f32 %v2034_v16, %v2043_v25 }
 0x11a   : > { %v2103_v30 = vpop.f32.mrf.mxu2  ;;  %v872_v42 = vadd.f32 %v871_v39, %v865_v52  ;;  %v887_v28 = vmul.f32 %v865_v52, %v865_v52  ;;  %v1249_v47 = vpack.c.bf16 %v865_v52, %v865_v52 }
 0x11c   : > { %v894_v11 = vadd.f32 %v893_v46, %v887_v28  ;;  %1266 = vst.msk [vmem:[%s2041_s24 + $0x30] sm:$0xf] %vm1253_vm7, %v1249_v47 }
 0x11d   : > { %v788_v12 = vpop.f32.mrf.mxu0 }
 0x11e   : > { %v1170_v6 = vpop.f32.mrf.mxu3  ;;  %v798_v44 = vadd.f32 %v788_v12, %v721_v41  ;;  %v972_v41 = vadd.f32 %v2080_v21, %v2083_v43 }
 0x120   : > { %v866_v3 = vadd.f32 %v856_v50, %v798_v44  ;;  %v1051_v19 = vpop.f32.mrf.mxu1 }
 0x122   : > { %v1114_v14 = vpop.f32.mrf.mxu2  ;;  %v2108_v38 = vadd.f32 %v872_v42, %v866_v3  ;;  %v888_v13 = vmul.f32 %v866_v3, %v866_v3  ;;  %v1251_v18 = vpack.c.bf16 %v866_v3, %v866_v3 }
 0x124   : > { %v2112_v40 = vadd.f32 %v894_v11, %v888_v13  ;;  %1268 = vst.msk [vmem:[%s2041_s24 + $0x38] sm:$0xf] %vm1253_vm7, %v1251_v18  ;;  %v975_v18 = vadd.f32 %v2090_v61, %v2093_v5  ;;  %v977_v61 = vadd.f32 %v2100_v37, %v2103_v30 }
 0x125   : > { %v997_v54 = vpop.f32.mrf.mxu0 }
 0x126   : > { %v1017_v31 = vadd.f32 %v997_v54, %v960_v36  ;;  %v1172_v58 = vpop.f32.mrf.mxu3 }
 0x128   : > { %v1069_v8 = vadd.f32 %v1049_v4, %v1017_v31  ;;  %v1054_v22 = vpop.f32.mrf.mxu1 }
 0x12a   : > { %v1116_v49 = vpop.f32.mrf.mxu2  ;;  %v1134_v55 = vadd.f32 %v1114_v14, %v1069_v8 }
 0x12c   : > { %v2116_v32 = vadd.f32 %v1170_v6, %v1134_v55 }
 0x12d   : > { %v999_v24 = vpop.f32.mrf.mxu0 }
 0x12e   : > { %v1238_v15 = vpack.c.bf16 %v2116_v32, %v2116_v32  ;;  %v1018_v26 = vadd.f32 %v999_v24, %v962_v33  ;;  %v1175_v7 = vpop.f32.mrf.mxu3 }
 0x130   : > { %1255 = vst.msk [vmem:[%s2041_s24 + $0x4] sm:$0xf] %vm1253_vm7, %v1238_v15  ;;  %v1070_v20 = vadd.f32 %v1051_v19, %v1018_v26  ;;  %v1056_v0 = vpop.f32.mrf.mxu1 }
 0x132   : > { %v1119_v62 = vpop.f32.mrf.mxu2  ;;  %v1135_v53 = vadd.f32 %v1116_v49, %v1070_v20  ;;  %v1212_v49 = vmul.f32 %v2116_v32, %v2116_v32 }
 0x134   : > { %v1191_v48 = vadd.f32 %v1172_v58, %v1135_v53 }
 0x135   : > { %v1002_v60 = vpop.f32.mrf.mxu0 }
 0x136   : > { %v1019_v16 = vadd.f32 %v1002_v60, %v965_v10  ;;  %v1240_v25 = vpack.c.bf16 %v1191_v48, %v1191_v48  ;;  %v1177_v39 = vpop.f32.mrf.mxu3  ;;  %v1213_v21 = vmul.f32 %v1191_v48, %v1191_v48  ;;  %v1198_v24 = vadd.f32 %v1191_v48, %v2116_v32 }
 0x138   : > { %v1071_v50 = vadd.f32 %v1054_v22, %v1019_v16  ;;  %1257 = vst.msk [vmem:[%s2041_s24 + $0xc] sm:$0xf] %vm1253_vm7, %v1240_v25  ;;  %v1059_v34 = vpop.f32.mrf.mxu1  ;;  %v1220_v15 = vadd.f32 %v1213_v21, %v1212_v49  ;;  %v874_v25 = vrot.slane %v2108_v38, 4 }
 0x13a   : > { %v1121_v1 = vpop.f32.mrf.mxu2  ;;  %v1136_v2 = vadd.f32 %v1119_v62, %v1071_v50 }
 0x13c   : > { %v1192_v35 = vadd.f32 %v1175_v7, %v1136_v2 }
 0x13d   : > { %v1004_v17 = vpop.f32.mrf.mxu0 }
 0x13e   : > { %v1242_v46 = vpack.c.bf16 %v1192_v35, %v1192_v35  ;;  %v1020_v56 = vadd.f32 %v1004_v17, %v967_v23  ;;  %v1180_v4 = vpop.f32.mrf.mxu3  ;;  %v1214_v55 = vmul.f32 %v1192_v35, %v1192_v35  ;;  %v1199_v5 = vadd.f32 %v1198_v24, %v1192_v35 }
 0x13f   : > { %v875_v17 = vadd.f32 %v874_v25, %v2108_v38 }
 0x140   : > { %1259 = vst.msk [vmem:[%s2041_s24 + $0x14] sm:$0xf] %vm1253_vm7, %v1242_v46  ;;  %v1072_v63 = vadd.f32 %v1056_v0, %v1020_v56  ;;  %v1061_v11 = vpop.f32.mrf.mxu1  ;;  %v1221_v7 = vadd.f32 %v1220_v15, %v1214_v55  ;;  %v896_v0 = vrot.slane %v2112_v40, 4 }
 0x142   : > { %v1137_v57 = vadd.f32 %v1121_v1, %v1072_v63  ;;  %v1124_v29 = vpop.f32.mrf.mxu2  ;;  %v897_v56 = vadd.f32 %v896_v0, %v2112_v40 }
 0x144   : > { %v1193_v52 = vadd.f32 %v1177_v39, %v1137_v57 }
 0x145   : > { %v1007_v42 = vpop.f32.mrf.mxu0 }
 0x146   : > { %v1244_v28 = vpack.c.bf16 %v1193_v52, %v1193_v52  ;;  %v1021_v9 = vadd.f32 %v1007_v42, %v970_v27  ;;  %v1182_v59 = vpop.f32.mrf.mxu3  ;;  %v1215_v26 = vmul.f32 %v1193_v52, %v1193_v52  ;;  %v1200_v53 = vadd.f32 %v1199_v5, %v1193_v52 }
 0x147   : > { %v876_v42 = vrot.slane %v875_v17, 2 }
 0x148   : > { %1261 = vst.msk [vmem:[%s2041_s24 + $0x1c] sm:$0xf] %vm1253_vm7, %v1244_v28  ;;  %v1073_v45 = vadd.f32 %v1059_v34, %v1021_v9  ;;  %v1064_v36 = vpop.f32.mrf.mxu1  ;;  %v1222_v48 = vadd.f32 %v1221_v7, %v1215_v26  ;;  %v898_v28 = vrot.slane %v897_v56, 2 }
 0x149   : > { %v877_v38 = vadd.f32 %v876_v42, %v875_v17 }
 0x14a   : > { %v1138_v47 = vadd.f32 %v1124_v29, %v1073_v45  ;;  %v1126_v44 = vpop.f32.mrf.mxu2 }
 0x14c   : > { %v1194_v12 = vadd.f32 %v1180_v4, %v1138_v47 }
 0x14d   : > { %v1009_v6 = vpop.f32.mrf.mxu0 }
 0x14e   : > { %v1246_v3 = vpack.c.bf16 %v1194_v12, %v1194_v12  ;;  %v1022_v51 = vadd.f32 %v1009_v6, %v972_v41  ;;  %v1185_v33 = vpop.f32.mrf.mxu3  ;;  %v1216_v10 = vmul.f32 %v1194_v12, %v1194_v12  ;;  %v1201_v50 = vadd.f32 %v1200_v53, %v1194_v12 }
 0x14f   : > { %v899_v41 = vadd.f32 %v898_v28, %v897_v56 }
 0x150   : > { %1263 = vst.msk [vmem:[%s2041_s24 + $0x24] sm:$0xf] %vm1253_vm7, %v1246_v3  ;;  %v1074_v14 = vadd.f32 %v1061_v11, %v1022_v51  ;;  %v1066_v32 = vpop.f32.mrf.mxu1  ;;  %v1223_v2 = vadd.f32 %v1222_v48, %v1216_v10  ;;  %v878_v3 = vrot.slane %v877_v38, 1 }
 0x151   : > { %v900_v51 = vrot.slane %v899_v41, 1 }
 0x152   : > { %v1139_v13 = vadd.f32 %v1126_v44, %v1074_v14  ;;  %v1129_v43 = vpop.f32.mrf.mxu2 }
 0x154   : > { %v1195_v19 = vadd.f32 %v1182_v59, %v1139_v13 }
 0x155   : > { %v1012_v54 = vpop.f32.mrf.mxu0 }
 0x156   : > { %v1248_v31 = vpack.c.bf16 %v1195_v19, %v1195_v19  ;;  %v1023_v58 = vadd.f32 %v1012_v54, %v975_v18  ;;  %v1217_v1 = vmul.f32 %v1195_v19, %v1195_v19  ;;  %v1202_v39 = vadd.f32 %v1201_v50, %v1195_v19  ;;  %v1187_v46 = vpop.f32.mrf.mxu3 }
 0x157   : > { %v879_v19 = vadd.f32 %v878_v3, %v877_v38 }
 0x158   : > { %1265 = vst.msk [vmem:[%s2041_s24 + $0x2c] sm:$0xf] %vm1253_vm7, %v1248_v31  ;;  %v1075_v8 = vadd.f32 %v1064_v36, %v1023_v58  ;;  %v1224_v63 = vadd.f32 %v1223_v2, %v1217_v1  ;;  %v901_v36 = vadd.f32 %v900_v51, %v899_v41 }
 0x15a   : > { %v1140_v22 = vadd.f32 %v1129_v43, %v1075_v8  ;;  %v1131_v30 = vpop.f32.mrf.mxu2 }
 0x15c   : > { %v1196_v20 = vadd.f32 %v1185_v33, %v1140_v22 }
 0x15d   : > { %v1014_v62 = vpop.f32.mrf.mxu0 }
 0x15e   : > { %v1250_v60 = vpack.c.bf16 %v1196_v20, %v1196_v20  ;;  %v1024_v16 = vadd.f32 %v1014_v62, %v977_v61  ;;  %v1218_v23 = vmul.f32 %v1196_v20, %v1196_v20  ;;  %v1203_v34 = vadd.f32 %v1202_v39, %v1196_v20 }
 0x160   : > { %1267 = vst.msk [vmem:[%s2041_s24 + $0x34] sm:$0xf] %vm1253_vm7, %v1250_v60  ;;  %v1076_v37 = vadd.f32 %v1066_v32, %v1024_v16  ;;  %v1225_v29 = vadd.f32 %v1224_v63, %v1218_v23 }
 0x162   : > { %v1141_v35 = vadd.f32 %v1131_v30, %v1076_v37 }
 0x164   : > { %v1197_v57 = vadd.f32 %v1187_v46, %v1141_v35 }
 0x166   : > { %v1204_v27 = vadd.f32 %v1203_v34, %v1197_v57  ;;  %v1219_v52 = vmul.f32 %v1197_v57, %v1197_v57  ;;  %v1252_v4 = vpack.c.bf16 %v1197_v57, %v1197_v57 }
 0x168   : > { %v1205_v9 = vrot.slane %v1204_v27, 4  ;;  %v1226_v45 = vadd.f32 %v1225_v29, %v1219_v52  ;;  %1269 = vst.msk [vmem:[%s2041_s24 + $0x3c] sm:$0xf] %vm1253_vm7, %v1252_v4 }
 0x16a   : > { %v1206_v47 = vadd.f32 %v1205_v9, %v1204_v27  ;;  %v1227_v11 = vrot.slane %v1226_v45, 4 }
 0x16c   : > { %v1207_v12 = vrot.slane %v1206_v47, 2  ;;  %v1228_v40 = vadd.f32 %v1227_v11, %v1226_v45 }
 0x16e   : > { %v1208_v6 = vadd.f32 %v1207_v12, %v1206_v47  ;;  %v1229_v44 = vrot.slane %v1228_v40, 2 }
 0x170   : > { %v1209_v59 = vrot.slane %v1208_v6, 1  ;;  %v1230_v14 = vadd.f32 %v1229_v44, %v1228_v40 }
 0x172   : > { %v1210_v13 = vadd.f32 %v1209_v59, %v1208_v6  ;;  %v1231_v18 = vrot.slane %v1230_v14, 1 }
 0x174   : > { %v1232_v54 = vadd.f32 %v1231_v18, %v1230_v14  ;;  %v1211_v31 = vadd.f32 %v1210_v13, %v879_v19 }
 0x176   : > { %v1233_v58 = vadd.f32 %v1232_v54, %v901_v36 }
 0x178   : > { %v1235_v21 = vsel %vm1234_vm8, %v1211_v31, %v1233_v58 }
 0x179   : > { %1236 = vst [vmem:[%s212_s28] sm:$0x3] %v1235_v21 }
 0x17a PF: > { %s14_s14 = sadd.s32 1, %s1593_s14   ;;  %s2178_s12 = smov %s1589_s13 }
 0x17b   : > { %p11_p5 = scmp.ge.s32.totalorder %s14_s14, 4   ;;  %s2179_s13 = smov %s2181_s15 }
 0x17d   :  { %13 = sbr.rel (!%p11_p5) target bundleno = 2 (0x2), region = 82 }

</bundles_post_ra>
